<compile_context>
chip_gen: v7x
topology: tpu7x:2x2x1
jax: 0.10.0
libtpu: 0.0.40
codegen_flags: <defaults>
</compile_context>

<pallas_src>
import numpy as np
import jax
import jax.numpy as jnp
from jax.experimental import pallas as pl
from jax.experimental.pallas import tpu as pltpu


def _make_decoder_kernel(seq_len, input_dim, n_features):
    D = input_dim
    H = 2 * input_dim

    def kernel(x_ref, wih1_ref, whh1_ref, b1_ref,
               wih2_ref, whh2_ref, b2_ref, wout_ref, bout_ref, out_ref):
        # Hoist all weight / bias loads: one vld each, reused across the
        # fully-unrolled recurrence (bf16 recurrent weights ~14 vregs at D=32).
        x = x_ref[...].astype(jnp.float32)          # (1, D)   f32
        whh1 = whh1_ref[...]                        # (D, 4D)  bf16
        wih2 = wih2_ref[...]                        # (D, 4H)  bf16
        whh2 = whh2_ref[...]                        # (H, 4H)  bf16
        b2 = b2_ref[...]                            # (1, 4H)  f32

        # Layer-1 input contribution is constant across time (repeated latent);
        # computed once before the recurrence, full f32.
        xw1 = (jnp.dot(x, wih1_ref[...], preferred_element_type=jnp.float32)
               + b1_ref[...])                       # (1, 4D)  f32

        h1 = jnp.zeros((1, D), jnp.float32)
        c1 = jnp.zeros((1, D), jnp.float32)
        h2 = jnp.zeros((1, H), jnp.float32)
        c2 = jnp.zeros((1, H), jnp.float32)

        def lstm_step(z, c, hid):
            # Gate column order is [i, f, o, g]: one tanh-based sigmoid over
            # the first 3*hid lanes and one tanh over the last hid lanes
            # -> exactly two EUP pushes per layer per step.
            s = 0.5 * jnp.tanh(0.5 * z[:, :3 * hid]) + 0.5
            g = jnp.tanh(z[:, 3 * hid:])
            i = s[:, :hid]
            f = s[:, hid:2 * hid]
            o = s[:, 2 * hid:3 * hid]
            # TODO(synk): the sub-128-lane gate slices imply XLU lane rotates;
            # a c-vector-rolled-to-gate-offset formulation would shave a few %.
            c_new = f * c + i * g
            h_new = o * jnp.tanh(c_new)
            return h_new, c_new

        # Layer-2 recurrent term for step t depends only on h2(t-1); keeping it
        # as a separate running value lets the (H, 4H) matmul overlap layer-1
        # of the following step instead of waiting on h1(t).
        z2_rec = b2                                  # h2(0-) == 0

        # seq_len is a small compile-time constant -> fully unrolled recurrence.
        # Per-step h2 stays in vregs; no VMEM scratch round-trip.
        h2_steps = []
        for t in range(seq_len):
            # ---- LSTM layer 1 (hidden = D), bf16 MXU operands / f32 acc ----
            z1 = xw1 + jnp.dot(h1.astype(jnp.bfloat16), whh1,
                               preferred_element_type=jnp.float32)
            h1, c1 = lstm_step(z1, c1, D)
            # ---- LSTM layer 2 (hidden = H): only the h1-dependent half sits
            #      behind layer-1 on the serial chain ----
            z2 = z2_rec + jnp.dot(h1.astype(jnp.bfloat16), wih2,
                                  preferred_element_type=jnp.float32)
            h2, c2 = lstm_step(z2, c2, H)
            h2_steps.append(h2)
            if t + 1 < seq_len:
                # Issue next step's recurrent term immediately; it overlaps the
                # next step's layer-1 matmul + activations.
                z2_rec = b2 + jnp.dot(h2.astype(jnp.bfloat16), whh2,
                                      preferred_element_type=jnp.float32)

        h2_all = jnp.concatenate(h2_steps, axis=0)               # (seq_len, H) f32
        # ---- output linear as VPU multiply + lane reduce (no N=1 MXU matmul) ----
        w_row = wout_ref[...]                                    # (1, H) f32
        out = jnp.sum(h2_all * w_row, axis=-1, keepdims=True) + bout_ref[...]
        out_ref[...] = out.astype(out_ref.dtype)                 # (seq_len, n_features)

    return kernel


def decoder_forward(x, kparams, *, seq_len, input_dim, n_features=1):
    kernel = _make_decoder_kernel(seq_len, input_dim, n_features)
    args = (x,
            kparams["wih1"], kparams["whh1"], kparams["b1"],
            kparams["wih2"], kparams["whh2"], kparams["b2"],
            kparams["wout"], kparams["bout"])
    vmem = pl.BlockSpec(memory_space=pltpu.MemorySpace.VMEM)
    return pl.pallas_call(
        kernel,
        out_shape=jax.ShapeDtypeStruct((seq_len, n_features), jnp.float32),
        in_specs=[vmem] * len(args),
        out_specs=vmem,
    )(*args)


# ----------------------------------------------------------------------------
# Parameter construction: raw torch-style weights + kernel-layout conversion.
# ----------------------------------------------------------------------------
def init_torch_params(key, input_dim, n_features=1):
    """Deterministic synthetic torch-style params, uniform(-1/sqrt(h), 1/sqrt(h)).
    Gate order of the raw weights is torch's [i, f, g, o]."""
    D, H = input_dim, 2 * input_dim
    ks = jax.random.split(key, 10)

    def u(k, shape, bound):
        return jax.random.uniform(k, shape, jnp.float32, -bound, bound)

    b1v = 1.0 / (D ** 0.5)
    b2v = 1.0 / (H ** 0.5)
    return {
        "w_ih1": u(ks[0], (4 * D, D), b1v), "w_hh1": u(ks[1], (4 * D, D), b1v),
        "b_ih1": u(ks[2], (4 * D,), b1v),   "b_hh1": u(ks[3], (4 * D,), b1v),
        "w_ih2": u(ks[4], (4 * H, D), b2v), "w_hh2": u(ks[5], (4 * H, H), b2v),
        "b_ih2": u(ks[6], (4 * H,), b2v),   "b_hh2": u(ks[7], (4 * H,), b2v),
        "w_out": u(ks[8], (n_features, H), b2v),
        "b_out": u(ks[9], (n_features,), b2v),
    }


def prepare_kernel_params(tp, input_dim, n_features=1):
    """Convert raw torch-style params to kernel layout: transpose, fold biases,
    permute gates [i,f,g,o] -> [i,f,o,g] (weights AND biases, consistently),
    and cast the per-step recurrent-path weights to bf16 for the MXU."""
    D, H = input_dim, 2 * input_dim

    def perm(w):
        # w has leading dim 4*hid in torch block order [i, f, g, o].
        i, f, g, o = jnp.split(w, 4, axis=0)
        return jnp.concatenate([i, f, o, g], axis=0)

    return {
        # layer 1: input term computed once (f32); recurrent weight bf16.
        "wih1": perm(tp["w_ih1"]).T,                                   # (D, 4D) f32
        "whh1": perm(tp["w_hh1"]).T.astype(jnp.bfloat16),              # (D, 4D) bf16
        "b1":   perm(tp["b_ih1"] + tp["b_hh1"])[None, :],              # (1, 4D) f32
        # layer 2: both halves on the per-step path -> bf16.
        "wih2": perm(tp["w_ih2"]).T.astype(jnp.bfloat16),              # (D, 4H) bf16
        "whh2": perm(tp["w_hh2"]).T.astype(jnp.bfloat16),              # (H, 4H) bf16
        "b2":   perm(tp["b_ih2"] + tp["b_hh2"])[None, :],              # (1, 4H) f32
        # output projection as a row for the VPU-multiply epilogue.
        "wout": tp["w_out"],                                           # (1, H)  f32
        "bout": tp["b_out"][None, :],                                  # (1, nf) f32
    }


def decoder_ref(x, tp, seq_len, input_dim, n_features=1):
    """Pure-JAX f32 reference matching torch Decoder.forward semantics,
    using the raw torch-order [i, f, g, o] parameters (no permutation)."""
    D, H = input_dim, 2 * input_dim
    # torch: x.repeat(seq_len, n_features).reshape((n_features, seq_len, input_dim))
    xs = jnp.tile(x, (seq_len, n_features)).reshape(n_features, seq_len, D)[0]

    def lstm(seq, w_ih, w_hh, b_ih, b_hh, hid):
        h = jnp.zeros((1, hid), jnp.float32)
        c = jnp.zeros((1, hid), jnp.float32)
        outs = []
        for t in range(seq.shape[0]):
            z = seq[t:t + 1] @ w_ih.T + h @ w_hh.T + b_ih + b_hh
            i = jax.nn.sigmoid(z[:, :hid])
            f = jax.nn.sigmoid(z[:, hid:2 * hid])
            g = jnp.tanh(z[:, 2 * hid:3 * hid])
            o = jax.nn.sigmoid(z[:, 3 * hid:])
            c = f * c + i * g
            h = o * jnp.tanh(c)
            outs.append(h)
        return jnp.concatenate(outs, axis=0)

    h1s = lstm(xs, tp["w_ih1"], tp["w_hh1"], tp["b_ih1"], tp["b_hh1"], D)
    h2s = lstm(h1s, tp["w_ih2"], tp["w_hh2"], tp["b_ih2"], tp["b_hh2"], H)
    return h2s @ tp["w_out"].T + tp["b_out"]


if __name__ == "__main__":
    seq_len, input_dim, n_features = 8, 32, 1
    key = jax.random.PRNGKey(0)
    kx, kp = jax.random.split(key)
    x = jax.random.normal(kx, (n_features, input_dim), jnp.float32)

    torch_params = init_torch_params(kp, input_dim, n_features)
    kparams = prepare_kernel_params(torch_params, input_dim, n_features)

    out = decoder_forward(x, kparams, seq_len=seq_len, input_dim=input_dim,
                          n_features=n_features)
    out = jax.block_until_ready(out)

    ref = decoder_ref(x, torch_params, seq_len, input_dim, n_features)
    assert out.shape == (seq_len, n_features)
    # Tolerance relaxed (f32 ref vs bf16 MXU operands on the recurrent path).
    np.testing.assert_allclose(np.asarray(out), np.asarray(ref),
                               rtol=2e-2, atol=2e-2)
    print("KERNEL_OK")
</pallas_src>

<mosaic_0001>
module attributes {stable_mosaic.version = 11 : i64} {
  func.func @kernel(%arg0: memref<1x32xf32, #tpu.memory_space<vmem>>, %arg1: memref<32x128xf32, #tpu.memory_space<vmem>>, %arg2: memref<32x128xbf16, #tpu.memory_space<vmem>>, %arg3: memref<1x128xf32, #tpu.memory_space<vmem>>, %arg4: memref<32x256xbf16, #tpu.memory_space<vmem>>, %arg5: memref<64x256xbf16, #tpu.memory_space<vmem>>, %arg6: memref<1x256xf32, #tpu.memory_space<vmem>>, %arg7: memref<1x64xf32, #tpu.memory_space<vmem>>, %arg8: memref<1x1xf32, #tpu.memory_space<vmem>>, %arg9: memref<8x1xf32, #tpu.memory_space<vmem>>) attributes {dimension_semantics = [], scalar_prefetch = 0 : i64, scratch_operands = 0 : i64, tpu.core_type = #tpu.core_type<tc>} {
    %c0 = arith.constant 0 : index
    %c0_0 = arith.constant 0 : index
    %0 = vector.load %arg0[%c0, %c0_0] : memref<1x32xf32, #tpu.memory_space<vmem>>, vector<1x32xf32>
    %c0_1 = arith.constant 0 : index
    %c0_2 = arith.constant 0 : index
    %1 = vector.load %arg2[%c0_1, %c0_2] : memref<32x128xbf16, #tpu.memory_space<vmem>>, vector<32x128xbf16>
    %c0_3 = arith.constant 0 : index
    %c0_4 = arith.constant 0 : index
    %2 = vector.load %arg4[%c0_3, %c0_4] : memref<32x256xbf16, #tpu.memory_space<vmem>>, vector<32x256xbf16>
    %c0_5 = arith.constant 0 : index
    %c0_6 = arith.constant 0 : index
    %3 = vector.load %arg5[%c0_5, %c0_6] : memref<64x256xbf16, #tpu.memory_space<vmem>>, vector<64x256xbf16>
    %c0_7 = arith.constant 0 : index
    %c0_8 = arith.constant 0 : index
    %4 = vector.load %arg6[%c0_7, %c0_8] : memref<1x256xf32, #tpu.memory_space<vmem>>, vector<1x256xf32>
    %c0_9 = arith.constant 0 : index
    %c0_10 = arith.constant 0 : index
    %5 = vector.load %arg1[%c0_9, %c0_10] : memref<32x128xf32, #tpu.memory_space<vmem>>, vector<32x128xf32>
    %cst = arith.constant dense<0.000000e+00> : vector<1x128xf32>
    %6 = tpu.matmul %0, %5, %cst {dimension_numbers = #tpu.dot_dimension_numbers<[1], [0], [0], [1], [0, 0, 1, 1], [], []>} : vector<1x32xf32>, vector<32x128xf32>, vector<1x128xf32> -> vector<1x128xf32>
    %c0_11 = arith.constant 0 : index
    %c0_12 = arith.constant 0 : index
    %7 = vector.load %arg3[%c0_11, %c0_12] : memref<1x128xf32, #tpu.memory_space<vmem>>, vector<1x128xf32>
    %8 = arith.addf %6, %7 : vector<1x128xf32>
    %cst_13 = arith.constant 0.000000e+00 : f32
    %9 = vector.broadcast %cst_13 : f32 to vector<1x32xf32>
    %cst_14 = arith.constant 0.000000e+00 : f32
    %10 = vector.broadcast %cst_14 : f32 to vector<1x32xf32>
    %cst_15 = arith.constant 0.000000e+00 : f32
    %11 = vector.broadcast %cst_15 : f32 to vector<1x64xf32>
    %12 = arith.truncf %9 : vector<1x32xf32> to vector<1x32xbf16>
    %cst_16 = arith.constant dense<0.000000e+00> : vector<1x128xf32>
    %13 = tpu.matmul %12, %1, %cst_16 {dimension_numbers = #tpu.dot_dimension_numbers<[1], [0], [0], [1], [0, 0, 1, 1], [], []>} : vector<1x32xbf16>, vector<32x128xbf16>, vector<1x128xf32> -> vector<1x128xf32>
    %14 = arith.addf %8, %13 : vector<1x128xf32>
    %15 = vector.extract_strided_slice %14 {offsets = [0, 0], sizes = [1, 96], strides = [1, 1]} : vector<1x128xf32> to vector<1x96xf32>
    %cst_17 = arith.constant 5.000000e-01 : f32
    %16 = vector.broadcast %cst_17 : f32 to vector<1x96xf32>
    %17 = arith.mulf %16, %15 : vector<1x96xf32>
    %18 = math.tanh %17 : vector<1x96xf32>
    %cst_18 = arith.constant 5.000000e-01 : f32
    %19 = vector.broadcast %cst_18 : f32 to vector<1x96xf32>
    %20 = arith.mulf %19, %18 : vector<1x96xf32>
    %cst_19 = arith.constant 5.000000e-01 : f32
    %21 = vector.broadcast %cst_19 : f32 to vector<1x96xf32>
    %22 = arith.addf %20, %21 : vector<1x96xf32>
    %23 = vector.extract_strided_slice %14 {offsets = [0, 96], sizes = [1, 32], strides = [1, 1]} : vector<1x128xf32> to vector<1x32xf32>
    %24 = math.tanh %23 : vector<1x32xf32>
    %25 = vector.extract_strided_slice %22 {offsets = [0, 0], sizes = [1, 32], strides = [1, 1]} : vector<1x96xf32> to vector<1x32xf32>
    %26 = vector.extract_strided_slice %22 {offsets = [0, 32], sizes = [1, 32], strides = [1, 1]} : vector<1x96xf32> to vector<1x32xf32>
    %27 = vector.extract_strided_slice %22 {offsets = [0, 64], sizes = [1, 32], strides = [1, 1]} : vector<1x96xf32> to vector<1x32xf32>
    %28 = arith.mulf %26, %10 : vector<1x32xf32>
    %29 = arith.mulf %25, %24 : vector<1x32xf32>
    %30 = arith.addf %28, %29 : vector<1x32xf32>
    %31 = math.tanh %30 : vector<1x32xf32>
    %32 = arith.mulf %27, %31 : vector<1x32xf32>
    %33 = arith.truncf %32 : vector<1x32xf32> to vector<1x32xbf16>
    %cst_20 = arith.constant dense<0.000000e+00> : vector<1x256xf32>
    %34 = tpu.matmul %33, %2, %cst_20 {dimension_numbers = #tpu.dot_dimension_numbers<[1], [0], [0], [1], [0, 0, 1, 1], [], []>} : vector<1x32xbf16>, vector<32x256xbf16>, vector<1x256xf32> -> vector<1x256xf32>
    %35 = arith.addf %4, %34 : vector<1x256xf32>
    %36 = vector.extract_strided_slice %35 {offsets = [0, 0], sizes = [1, 192], strides = [1, 1]} : vector<1x256xf32> to vector<1x192xf32>
    %cst_21 = arith.constant 5.000000e-01 : f32
    %37 = vector.broadcast %cst_21 : f32 to vector<1x192xf32>
    %38 = arith.mulf %37, %36 : vector<1x192xf32>
    %39 = math.tanh %38 : vector<1x192xf32>
    %cst_22 = arith.constant 5.000000e-01 : f32
    %40 = vector.broadcast %cst_22 : f32 to vector<1x192xf32>
    %41 = arith.mulf %40, %39 : vector<1x192xf32>
    %cst_23 = arith.constant 5.000000e-01 : f32
    %42 = vector.broadcast %cst_23 : f32 to vector<1x192xf32>
    %43 = arith.addf %41, %42 : vector<1x192xf32>
    %44 = vector.extract_strided_slice %35 {offsets = [0, 192], sizes = [1, 64], strides = [1, 1]} : vector<1x256xf32> to vector<1x64xf32>
    %45 = math.tanh %44 : vector<1x64xf32>
    %46 = vector.extract_strided_slice %43 {offsets = [0, 0], sizes = [1, 64], strides = [1, 1]} : vector<1x192xf32> to vector<1x64xf32>
    %47 = vector.extract_strided_slice %43 {offsets = [0, 64], sizes = [1, 64], strides = [1, 1]} : vector<1x192xf32> to vector<1x64xf32>
    %48 = vector.extract_strided_slice %43 {offsets = [0, 128], sizes = [1, 64], strides = [1, 1]} : vector<1x192xf32> to vector<1x64xf32>
    %49 = arith.mulf %47, %11 : vector<1x64xf32>
    %50 = arith.mulf %46, %45 : vector<1x64xf32>
    %51 = arith.addf %49, %50 : vector<1x64xf32>
    %52 = math.tanh %51 : vector<1x64xf32>
    %53 = arith.mulf %48, %52 : vector<1x64xf32>
    %54 = arith.truncf %53 : vector<1x64xf32> to vector<1x64xbf16>
    %cst_24 = arith.constant dense<0.000000e+00> : vector<1x256xf32>
    %55 = tpu.matmul %54, %3, %cst_24 {dimension_numbers = #tpu.dot_dimension_numbers<[1], [0], [0], [1], [0, 0, 1, 1], [], []>} : vector<1x64xbf16>, vector<64x256xbf16>, vector<1x256xf32> -> vector<1x256xf32>
    %56 = arith.addf %4, %55 : vector<1x256xf32>
    %57 = arith.truncf %32 : vector<1x32xf32> to vector<1x32xbf16>
    %cst_25 = arith.constant dense<0.000000e+00> : vector<1x128xf32>
    %58 = tpu.matmul %57, %1, %cst_25 {dimension_numbers = #tpu.dot_dimension_numbers<[1], [0], [0], [1], [0, 0, 1, 1], [], []>} : vector<1x32xbf16>, vector<32x128xbf16>, vector<1x128xf32> -> vector<1x128xf32>
    %59 = arith.addf %8, %58 : vector<1x128xf32>
    %60 = vector.extract_strided_slice %59 {offsets = [0, 0], sizes = [1, 96], strides = [1, 1]} : vector<1x128xf32> to vector<1x96xf32>
    %cst_26 = arith.constant 5.000000e-01 : f32
    %61 = vector.broadcast %cst_26 : f32 to vector<1x96xf32>
    %62 = arith.mulf %61, %60 : vector<1x96xf32>
    %63 = math.tanh %62 : vector<1x96xf32>
    %cst_27 = arith.constant 5.000000e-01 : f32
    %64 = vector.broadcast %cst_27 : f32 to vector<1x96xf32>
    %65 = arith.mulf %64, %63 : vector<1x96xf32>
    %cst_28 = arith.constant 5.000000e-01 : f32
    %66 = vector.broadcast %cst_28 : f32 to vector<1x96xf32>
    %67 = arith.addf %65, %66 : vector<1x96xf32>
    %68 = vector.extract_strided_slice %59 {offsets = [0, 96], sizes = [1, 32], strides = [1, 1]} : vector<1x128xf32> to vector<1x32xf32>
    %69 = math.tanh %68 : vector<1x32xf32>
    %70 = vector.extract_strided_slice %67 {offsets = [0, 0], sizes = [1, 32], strides = [1, 1]} : vector<1x96xf32> to vector<1x32xf32>
    %71 = vector.extract_strided_slice %67 {offsets = [0, 32], sizes = [1, 32], strides = [1, 1]} : vector<1x96xf32> to vector<1x32xf32>
    %72 = vector.extract_strided_slice %67 {offsets = [0, 64], sizes = [1, 32], strides = [1, 1]} : vector<1x96xf32> to vector<1x32xf32>
    %73 = arith.mulf %71, %30 : vector<1x32xf32>
    %74 = arith.mulf %70, %69 : vector<1x32xf32>
    %75 = arith.addf %73, %74 : vector<1x32xf32>
    %76 = math.tanh %75 : vector<1x32xf32>
    %77 = arith.mulf %72, %76 : vector<1x32xf32>
    %78 = arith.truncf %77 : vector<1x32xf32> to vector<1x32xbf16>
    %cst_29 = arith.constant dense<0.000000e+00> : vector<1x256xf32>
    %79 = tpu.matmul %78, %2, %cst_29 {dimension_numbers = #tpu.dot_dimension_numbers<[1], [0], [0], [1], [0, 0, 1, 1], [], []>} : vector<1x32xbf16>, vector<32x256xbf16>, vector<1x256xf32> -> vector<1x256xf32>
    %80 = arith.addf %56, %79 : vector<1x256xf32>
    %81 = vector.extract_strided_slice %80 {offsets = [0, 0], sizes = [1, 192], strides = [1, 1]} : vector<1x256xf32> to vector<1x192xf32>
    %cst_30 = arith.constant 5.000000e-01 : f32
    %82 = vector.broadcast %cst_30 : f32 to vector<1x192xf32>
    %83 = arith.mulf %82, %81 : vector<1x192xf32>
    %84 = math.tanh %83 : vector<1x192xf32>
    %cst_31 = arith.constant 5.000000e-01 : f32
    %85 = vector.broadcast %cst_31 : f32 to vector<1x192xf32>
    %86 = arith.mulf %85, %84 : vector<1x192xf32>
    %cst_32 = arith.constant 5.000000e-01 : f32
    %87 = vector.broadcast %cst_32 : f32 to vector<1x192xf32>
    %88 = arith.addf %86, %87 : vector<1x192xf32>
    %89 = vector.extract_strided_slice %80 {offsets = [0, 192], sizes = [1, 64], strides = [1, 1]} : vector<1x256xf32> to vector<1x64xf32>
    %90 = math.tanh %89 : vector<1x64xf32>
    %91 = vector.extract_strided_slice %88 {offsets = [0, 0], sizes = [1, 64], strides = [1, 1]} : vector<1x192xf32> to vector<1x64xf32>
    %92 = vector.extract_strided_slice %88 {offsets = [0, 64], sizes = [1, 64], strides = [1, 1]} : vector<1x192xf32> to vector<1x64xf32>
    %93 = vector.extract_strided_slice %88 {offsets = [0, 128], sizes = [1, 64], strides = [1, 1]} : vector<1x192xf32> to vector<1x64xf32>
    %94 = arith.mulf %92, %51 : vector<1x64xf32>
    %95 = arith.mulf %91, %90 : vector<1x64xf32>
    %96 = arith.addf %94, %95 : vector<1x64xf32>
    %97 = math.tanh %96 : vector<1x64xf32>
    %98 = arith.mulf %93, %97 : vector<1x64xf32>
    %99 = arith.truncf %98 : vector<1x64xf32> to vector<1x64xbf16>
    %cst_33 = arith.constant dense<0.000000e+00> : vector<1x256xf32>
    %100 = tpu.matmul %99, %3, %cst_33 {dimension_numbers = #tpu.dot_dimension_numbers<[1], [0], [0], [1], [0, 0, 1, 1], [], []>} : vector<1x64xbf16>, vector<64x256xbf16>, vector<1x256xf32> -> vector<1x256xf32>
    %101 = arith.addf %4, %100 : vector<1x256xf32>
    %102 = arith.truncf %77 : vector<1x32xf32> to vector<1x32xbf16>
    %cst_34 = arith.constant dense<0.000000e+00> : vector<1x128xf32>
    %103 = tpu.matmul %102, %1, %cst_34 {dimension_numbers = #tpu.dot_dimension_numbers<[1], [0], [0], [1], [0, 0, 1, 1], [], []>} : vector<1x32xbf16>, vector<32x128xbf16>, vector<1x128xf32> -> vector<1x128xf32>
    %104 = arith.addf %8, %103 : vector<1x128xf32>
    %105 = vector.extract_strided_slice %104 {offsets = [0, 0], sizes = [1, 96], strides = [1, 1]} : vector<1x128xf32> to vector<1x96xf32>
    %cst_35 = arith.constant 5.000000e-01 : f32
    %106 = vector.broadcast %cst_35 : f32 to vector<1x96xf32>
    %107 = arith.mulf %106, %105 : vector<1x96xf32>
    %108 = math.tanh %107 : vector<1x96xf32>
    %cst_36 = arith.constant 5.000000e-01 : f32
    %109 = vector.broadcast %cst_36 : f32 to vector<1x96xf32>
    %110 = arith.mulf %109, %108 : vector<1x96xf32>
    %cst_37 = arith.constant 5.000000e-01 : f32
    %111 = vector.broadcast %cst_37 : f32 to vector<1x96xf32>
    %112 = arith.addf %110, %111 : vector<1x96xf32>
    %113 = vector.extract_strided_slice %104 {offsets = [0, 96], sizes = [1, 32], strides = [1, 1]} : vector<1x128xf32> to vector<1x32xf32>
    %114 = math.tanh %113 : vector<1x32xf32>
    %115 = vector.extract_strided_slice %112 {offsets = [0, 0], sizes = [1, 32], strides = [1, 1]} : vector<1x96xf32> to vector<1x32xf32>
    %116 = vector.extract_strided_slice %112 {offsets = [0, 32], sizes = [1, 32], strides = [1, 1]} : vector<1x96xf32> to vector<1x32xf32>
    %117 = vector.extract_strided_slice %112 {offsets = [0, 64], sizes = [1, 32], strides = [1, 1]} : vector<1x96xf32> to vector<1x32xf32>
    %118 = arith.mulf %116, %75 : vector<1x32xf32>
    %119 = arith.mulf %115, %114 : vector<1x32xf32>
    %120 = arith.addf %118, %119 : vector<1x32xf32>
    %121 = math.tanh %120 : vector<1x32xf32>
    %122 = arith.mulf %117, %121 : vector<1x32xf32>
    %123 = arith.truncf %122 : vector<1x32xf32> to vector<1x32xbf16>
    %cst_38 = arith.constant dense<0.000000e+00> : vector<1x256xf32>
    %124 = tpu.matmul %123, %2, %cst_38 {dimension_numbers = #tpu.dot_dimension_numbers<[1], [0], [0], [1], [0, 0, 1, 1], [], []>} : vector<1x32xbf16>, vector<32x256xbf16>, vector<1x256xf32> -> vector<1x256xf32>
    %125 = arith.addf %101, %124 : vector<1x256xf32>
    %126 = vector.extract_strided_slice %125 {offsets = [0, 0], sizes = [1, 192], strides = [1, 1]} : vector<1x256xf32> to vector<1x192xf32>
    %cst_39 = arith.constant 5.000000e-01 : f32
    %127 = vector.broadcast %cst_39 : f32 to vector<1x192xf32>
    %128 = arith.mulf %127, %126 : vector<1x192xf32>
    %129 = math.tanh %128 : vector<1x192xf32>
    %cst_40 = arith.constant 5.000000e-01 : f32
    %130 = vector.broadcast %cst_40 : f32 to vector<1x192xf32>
    %131 = arith.mulf %130, %129 : vector<1x192xf32>
    %cst_41 = arith.constant 5.000000e-01 : f32
    %132 = vector.broadcast %cst_41 : f32 to vector<1x192xf32>
    %133 = arith.addf %131, %132 : vector<1x192xf32>
    %134 = vector.extract_strided_slice %125 {offsets = [0, 192], sizes = [1, 64], strides = [1, 1]} : vector<1x256xf32> to vector<1x64xf32>
    %135 = math.tanh %134 : vector<1x64xf32>
    %136 = vector.extract_strided_slice %133 {offsets = [0, 0], sizes = [1, 64], strides = [1, 1]} : vector<1x192xf32> to vector<1x64xf32>
    %137 = vector.extract_strided_slice %133 {offsets = [0, 64], sizes = [1, 64], strides = [1, 1]} : vector<1x192xf32> to vector<1x64xf32>
    %138 = vector.extract_strided_slice %133 {offsets = [0, 128], sizes = [1, 64], strides = [1, 1]} : vector<1x192xf32> to vector<1x64xf32>
    %139 = arith.mulf %137, %96 : vector<1x64xf32>
    %140 = arith.mulf %136, %135 : vector<1x64xf32>
    %141 = arith.addf %139, %140 : vector<1x64xf32>
    %142 = math.tanh %141 : vector<1x64xf32>
    %143 = arith.mulf %138, %142 : vector<1x64xf32>
    %144 = arith.truncf %143 : vector<1x64xf32> to vector<1x64xbf16>
    %cst_42 = arith.constant dense<0.000000e+00> : vector<1x256xf32>
    %145 = tpu.matmul %144, %3, %cst_42 {dimension_numbers = #tpu.dot_dimension_numbers<[1], [0], [0], [1], [0, 0, 1, 1], [], []>} : vector<1x64xbf16>, vector<64x256xbf16>, vector<1x256xf32> -> vector<1x256xf32>
    %146 = arith.addf %4, %145 : vector<1x256xf32>
    %147 = arith.truncf %122 : vector<1x32xf32> to vector<1x32xbf16>
    %cst_43 = arith.constant dense<0.000000e+00> : vector<1x128xf32>
    %148 = tpu.matmul %147, %1, %cst_43 {dimension_numbers = #tpu.dot_dimension_numbers<[1], [0], [0], [1], [0, 0, 1, 1], [], []>} : vector<1x32xbf16>, vector<32x128xbf16>, vector<1x128xf32> -> vector<1x128xf32>
    %149 = arith.addf %8, %148 : vector<1x128xf32>
    %150 = vector.extract_strided_slice %149 {offsets = [0, 0], sizes = [1, 96], strides = [1, 1]} : vector<1x128xf32> to vector<1x96xf32>
    %cst_44 = arith.constant 5.000000e-01 : f32
    %151 = vector.broadcast %cst_44 : f32 to vector<1x96xf32>
    %152 = arith.mulf %151, %150 : vector<1x96xf32>
    %153 = math.tanh %152 : vector<1x96xf32>
    %cst_45 = arith.constant 5.000000e-01 : f32
    %154 = vector.broadcast %cst_45 : f32 to vector<1x96xf32>
    %155 = arith.mulf %154, %153 : vector<1x96xf32>
    %cst_46 = arith.constant 5.000000e-01 : f32
    %156 = vector.broadcast %cst_46 : f32 to vector<1x96xf32>
    %157 = arith.addf %155, %156 : vector<1x96xf32>
    %158 = vector.extract_strided_slice %149 {offsets = [0, 96], sizes = [1, 32], strides = [1, 1]} : vector<1x128xf32> to vector<1x32xf32>
    %159 = math.tanh %158 : vector<1x32xf32>
    %160 = vector.extract_strided_slice %157 {offsets = [0, 0], sizes = [1, 32], strides = [1, 1]} : vector<1x96xf32> to vector<1x32xf32>
    %161 = vector.extract_strided_slice %157 {offsets = [0, 32], sizes = [1, 32], strides = [1, 1]} : vector<1x96xf32> to vector<1x32xf32>
    %162 = vector.extract_strided_slice %157 {offsets = [0, 64], sizes = [1, 32], strides = [1, 1]} : vector<1x96xf32> to vector<1x32xf32>
    %163 = arith.mulf %161, %120 : vector<1x32xf32>
    %164 = arith.mulf %160, %159 : vector<1x32xf32>
    %165 = arith.addf %163, %164 : vector<1x32xf32>
    %166 = math.tanh %165 : vector<1x32xf32>
    %167 = arith.mulf %162, %166 : vector<1x32xf32>
    %168 = arith.truncf %167 : vector<1x32xf32> to vector<1x32xbf16>
    %cst_47 = arith.constant dense<0.000000e+00> : vector<1x256xf32>
    %169 = tpu.matmul %168, %2, %cst_47 {dimension_numbers = #tpu.dot_dimension_numbers<[1], [0], [0], [1], [0, 0, 1, 1], [], []>} : vector<1x32xbf16>, vector<32x256xbf16>, vector<1x256xf32> -> vector<1x256xf32>
    %170 = arith.addf %146, %169 : vector<1x256xf32>
    %171 = vector.extract_strided_slice %170 {offsets = [0, 0], sizes = [1, 192], strides = [1, 1]} : vector<1x256xf32> to vector<1x192xf32>
    %cst_48 = arith.constant 5.000000e-01 : f32
    %172 = vector.broadcast %cst_48 : f32 to vector<1x192xf32>
    %173 = arith.mulf %172, %171 : vector<1x192xf32>
    %174 = math.tanh %173 : vector<1x192xf32>
    %cst_49 = arith.constant 5.000000e-01 : f32
    %175 = vector.broadcast %cst_49 : f32 to vector<1x192xf32>
    %176 = arith.mulf %175, %174 : vector<1x192xf32>
    %cst_50 = arith.constant 5.000000e-01 : f32
    %177 = vector.broadcast %cst_50 : f32 to vector<1x192xf32>
    %178 = arith.addf %176, %177 : vector<1x192xf32>
    %179 = vector.extract_strided_slice %170 {offsets = [0, 192], sizes = [1, 64], strides = [1, 1]} : vector<1x256xf32> to vector<1x64xf32>
    %180 = math.tanh %179 : vector<1x64xf32>
    %181 = vector.extract_strided_slice %178 {offsets = [0, 0], sizes = [1, 64], strides = [1, 1]} : vector<1x192xf32> to vector<1x64xf32>
    %182 = vector.extract_strided_slice %178 {offsets = [0, 64], sizes = [1, 64], strides = [1, 1]} : vector<1x192xf32> to vector<1x64xf32>
    %183 = vector.extract_strided_slice %178 {offsets = [0, 128], sizes = [1, 64], strides = [1, 1]} : vector<1x192xf32> to vector<1x64xf32>
    %184 = arith.mulf %182, %141 : vector<1x64xf32>
    %185 = arith.mulf %181, %180 : vector<1x64xf32>
    %186 = arith.addf %184, %185 : vector<1x64xf32>
    %187 = math.tanh %186 : vector<1x64xf32>
    %188 = arith.mulf %183, %187 : vector<1x64xf32>
    %189 = arith.truncf %188 : vector<1x64xf32> to vector<1x64xbf16>
    %cst_51 = arith.constant dense<0.000000e+00> : vector<1x256xf32>
    %190 = tpu.matmul %189, %3, %cst_51 {dimension_numbers = #tpu.dot_dimension_numbers<[1], [0], [0], [1], [0, 0, 1, 1], [], []>} : vector<1x64xbf16>, vector<64x256xbf16>, vector<1x256xf32> -> vector<1x256xf32>
    %191 = arith.addf %4, %190 : vector<1x256xf32>
    %192 = arith.truncf %167 : vector<1x32xf32> to vector<1x32xbf16>
    %cst_52 = arith.constant dense<0.000000e+00> : vector<1x128xf32>
    %193 = tpu.matmul %192, %1, %cst_52 {dimension_numbers = #tpu.dot_dimension_numbers<[1], [0], [0], [1], [0, 0, 1, 1], [], []>} : vector<1x32xbf16>, vector<32x128xbf16>, vector<1x128xf32> -> vector<1x128xf32>
    %194 = arith.addf %8, %193 : vector<1x128xf32>
    %195 = vector.extract_strided_slice %194 {offsets = [0, 0], sizes = [1, 96], strides = [1, 1]} : vector<1x128xf32> to vector<1x96xf32>
    %cst_53 = arith.constant 5.000000e-01 : f32
    %196 = vector.broadcast %cst_53 : f32 to vector<1x96xf32>
    %197 = arith.mulf %196, %195 : vector<1x96xf32>
    %198 = math.tanh %197 : vector<1x96xf32>
    %cst_54 = arith.constant 5.000000e-01 : f32
    %199 = vector.broadcast %cst_54 : f32 to vector<1x96xf32>
    %200 = arith.mulf %199, %198 : vector<1x96xf32>
    %cst_55 = arith.constant 5.000000e-01 : f32
    %201 = vector.broadcast %cst_55 : f32 to vector<1x96xf32>
    %202 = arith.addf %200, %201 : vector<1x96xf32>
    %203 = vector.extract_strided_slice %194 {offsets = [0, 96], sizes = [1, 32], strides = [1, 1]} : vector<1x128xf32> to vector<1x32xf32>
    %204 = math.tanh %203 : vector<1x32xf32>
    %205 = vector.extract_strided_slice %202 {offsets = [0, 0], sizes = [1, 32], strides = [1, 1]} : vector<1x96xf32> to vector<1x32xf32>
    %206 = vector.extract_strided_slice %202 {offsets = [0, 32], sizes = [1, 32], strides = [1, 1]} : vector<1x96xf32> to vector<1x32xf32>
    %207 = vector.extract_strided_slice %202 {offsets = [0, 64], sizes = [1, 32], strides = [1, 1]} : vector<1x96xf32> to vector<1x32xf32>
    %208 = arith.mulf %206, %165 : vector<1x32xf32>
    %209 = arith.mulf %205, %204 : vector<1x32xf32>
    %210 = arith.addf %208, %209 : vector<1x32xf32>
    %211 = math.tanh %210 : vector<1x32xf32>
    %212 = arith.mulf %207, %211 : vector<1x32xf32>
    %213 = arith.truncf %212 : vector<1x32xf32> to vector<1x32xbf16>
    %cst_56 = arith.constant dense<0.000000e+00> : vector<1x256xf32>
    %214 = tpu.matmul %213, %2, %cst_56 {dimension_numbers = #tpu.dot_dimension_numbers<[1], [0], [0], [1], [0, 0, 1, 1], [], []>} : vector<1x32xbf16>, vector<32x256xbf16>, vector<1x256xf32> -> vector<1x256xf32>
    %215 = arith.addf %191, %214 : vector<1x256xf32>
    %216 = vector.extract_strided_slice %215 {offsets = [0, 0], sizes = [1, 192], strides = [1, 1]} : vector<1x256xf32> to vector<1x192xf32>
    %cst_57 = arith.constant 5.000000e-01 : f32
    %217 = vector.broadcast %cst_57 : f32 to vector<1x192xf32>
    %218 = arith.mulf %217, %216 : vector<1x192xf32>
    %219 = math.tanh %218 : vector<1x192xf32>
    %cst_58 = arith.constant 5.000000e-01 : f32
    %220 = vector.broadcast %cst_58 : f32 to vector<1x192xf32>
    %221 = arith.mulf %220, %219 : vector<1x192xf32>
    %cst_59 = arith.constant 5.000000e-01 : f32
    %222 = vector.broadcast %cst_59 : f32 to vector<1x192xf32>
    %223 = arith.addf %221, %222 : vector<1x192xf32>
    %224 = vector.extract_strided_slice %215 {offsets = [0, 192], sizes = [1, 64], strides = [1, 1]} : vector<1x256xf32> to vector<1x64xf32>
    %225 = math.tanh %224 : vector<1x64xf32>
    %226 = vector.extract_strided_slice %223 {offsets = [0, 0], sizes = [1, 64], strides = [1, 1]} : vector<1x192xf32> to vector<1x64xf32>
    %227 = vector.extract_strided_slice %223 {offsets = [0, 64], sizes = [1, 64], strides = [1, 1]} : vector<1x192xf32> to vector<1x64xf32>
    %228 = vector.extract_strided_slice %223 {offsets = [0, 128], sizes = [1, 64], strides = [1, 1]} : vector<1x192xf32> to vector<1x64xf32>
    %229 = arith.mulf %227, %186 : vector<1x64xf32>
    %230 = arith.mulf %226, %225 : vector<1x64xf32>
    %231 = arith.addf %229, %230 : vector<1x64xf32>
    %232 = math.tanh %231 : vector<1x64xf32>
    %233 = arith.mulf %228, %232 : vector<1x64xf32>
    %234 = arith.truncf %233 : vector<1x64xf32> to vector<1x64xbf16>
    %cst_60 = arith.constant dense<0.000000e+00> : vector<1x256xf32>
    %235 = tpu.matmul %234, %3, %cst_60 {dimension_numbers = #tpu.dot_dimension_numbers<[1], [0], [0], [1], [0, 0, 1, 1], [], []>} : vector<1x64xbf16>, vector<64x256xbf16>, vector<1x256xf32> -> vector<1x256xf32>
    %236 = arith.addf %4, %235 : vector<1x256xf32>
    %237 = arith.truncf %212 : vector<1x32xf32> to vector<1x32xbf16>
    %cst_61 = arith.constant dense<0.000000e+00> : vector<1x128xf32>
    %238 = tpu.matmul %237, %1, %cst_61 {dimension_numbers = #tpu.dot_dimension_numbers<[1], [0], [0], [1], [0, 0, 1, 1], [], []>} : vector<1x32xbf16>, vector<32x128xbf16>, vector<1x128xf32> -> vector<1x128xf32>
    %239 = arith.addf %8, %238 : vector<1x128xf32>
    %240 = vector.extract_strided_slice %239 {offsets = [0, 0], sizes = [1, 96], strides = [1, 1]} : vector<1x128xf32> to vector<1x96xf32>
    %cst_62 = arith.constant 5.000000e-01 : f32
    %241 = vector.broadcast %cst_62 : f32 to vector<1x96xf32>
    %242 = arith.mulf %241, %240 : vector<1x96xf32>
    %243 = math.tanh %242 : vector<1x96xf32>
    %cst_63 = arith.constant 5.000000e-01 : f32
    %244 = vector.broadcast %cst_63 : f32 to vector<1x96xf32>
    %245 = arith.mulf %244, %243 : vector<1x96xf32>
    %cst_64 = arith.constant 5.000000e-01 : f32
    %246 = vector.broadcast %cst_64 : f32 to vector<1x96xf32>
    %247 = arith.addf %245, %246 : vector<1x96xf32>
    %248 = vector.extract_strided_slice %239 {offsets = [0, 96], sizes = [1, 32], strides = [1, 1]} : vector<1x128xf32> to vector<1x32xf32>
    %249 = math.tanh %248 : vector<1x32xf32>
    %250 = vector.extract_strided_slice %247 {offsets = [0, 0], sizes = [1, 32], strides = [1, 1]} : vector<1x96xf32> to vector<1x32xf32>
    %251 = vector.extract_strided_slice %247 {offsets = [0, 32], sizes = [1, 32], strides = [1, 1]} : vector<1x96xf32> to vector<1x32xf32>
    %252 = vector.extract_strided_slice %247 {offsets = [0, 64], sizes = [1, 32], strides = [1, 1]} : vector<1x96xf32> to vector<1x32xf32>
    %253 = arith.mulf %251, %210 : vector<1x32xf32>
    %254 = arith.mulf %250, %249 : vector<1x32xf32>
    %255 = arith.addf %253, %254 : vector<1x32xf32>
    %256 = math.tanh %255 : vector<1x32xf32>
    %257 = arith.mulf %252, %256 : vector<1x32xf32>
    %258 = arith.truncf %257 : vector<1x32xf32> to vector<1x32xbf16>
    %cst_65 = arith.constant dense<0.000000e+00> : vector<1x256xf32>
    %259 = tpu.matmul %258, %2, %cst_65 {dimension_numbers = #tpu.dot_dimension_numbers<[1], [0], [0], [1], [0, 0, 1, 1], [], []>} : vector<1x32xbf16>, vector<32x256xbf16>, vector<1x256xf32> -> vector<1x256xf32>
    %260 = arith.addf %236, %259 : vector<1x256xf32>
    %261 = vector.extract_strided_slice %260 {offsets = [0, 0], sizes = [1, 192], strides = [1, 1]} : vector<1x256xf32> to vector<1x192xf32>
    %cst_66 = arith.constant 5.000000e-01 : f32
    %262 = vector.broadcast %cst_66 : f32 to vector<1x192xf32>
    %263 = arith.mulf %262, %261 : vector<1x192xf32>
    %264 = math.tanh %263 : vector<1x192xf32>
    %cst_67 = arith.constant 5.000000e-01 : f32
    %265 = vector.broadcast %cst_67 : f32 to vector<1x192xf32>
    %266 = arith.mulf %265, %264 : vector<1x192xf32>
    %cst_68 = arith.constant 5.000000e-01 : f32
    %267 = vector.broadcast %cst_68 : f32 to vector<1x192xf32>
    %268 = arith.addf %266, %267 : vector<1x192xf32>
    %269 = vector.extract_strided_slice %260 {offsets = [0, 192], sizes = [1, 64], strides = [1, 1]} : vector<1x256xf32> to vector<1x64xf32>
    %270 = math.tanh %269 : vector<1x64xf32>
    %271 = vector.extract_strided_slice %268 {offsets = [0, 0], sizes = [1, 64], strides = [1, 1]} : vector<1x192xf32> to vector<1x64xf32>
    %272 = vector.extract_strided_slice %268 {offsets = [0, 64], sizes = [1, 64], strides = [1, 1]} : vector<1x192xf32> to vector<1x64xf32>
    %273 = vector.extract_strided_slice %268 {offsets = [0, 128], sizes = [1, 64], strides = [1, 1]} : vector<1x192xf32> to vector<1x64xf32>
    %274 = arith.mulf %272, %231 : vector<1x64xf32>
    %275 = arith.mulf %271, %270 : vector<1x64xf32>
    %276 = arith.addf %274, %275 : vector<1x64xf32>
    %277 = math.tanh %276 : vector<1x64xf32>
    %278 = arith.mulf %273, %277 : vector<1x64xf32>
    %279 = arith.truncf %278 : vector<1x64xf32> to vector<1x64xbf16>
    %cst_69 = arith.constant dense<0.000000e+00> : vector<1x256xf32>
    %280 = tpu.matmul %279, %3, %cst_69 {dimension_numbers = #tpu.dot_dimension_numbers<[1], [0], [0], [1], [0, 0, 1, 1], [], []>} : vector<1x64xbf16>, vector<64x256xbf16>, vector<1x256xf32> -> vector<1x256xf32>
    %281 = arith.addf %4, %280 : vector<1x256xf32>
    %282 = arith.truncf %257 : vector<1x32xf32> to vector<1x32xbf16>
    %cst_70 = arith.constant dense<0.000000e+00> : vector<1x128xf32>
    %283 = tpu.matmul %282, %1, %cst_70 {dimension_numbers = #tpu.dot_dimension_numbers<[1], [0], [0], [1], [0, 0, 1, 1], [], []>} : vector<1x32xbf16>, vector<32x128xbf16>, vector<1x128xf32> -> vector<1x128xf32>
    %284 = arith.addf %8, %283 : vector<1x128xf32>
    %285 = vector.extract_strided_slice %284 {offsets = [0, 0], sizes = [1, 96], strides = [1, 1]} : vector<1x128xf32> to vector<1x96xf32>
    %cst_71 = arith.constant 5.000000e-01 : f32
    %286 = vector.broadcast %cst_71 : f32 to vector<1x96xf32>
    %287 = arith.mulf %286, %285 : vector<1x96xf32>
    %288 = math.tanh %287 : vector<1x96xf32>
    %cst_72 = arith.constant 5.000000e-01 : f32
    %289 = vector.broadcast %cst_72 : f32 to vector<1x96xf32>
    %290 = arith.mulf %289, %288 : vector<1x96xf32>
    %cst_73 = arith.constant 5.000000e-01 : f32
    %291 = vector.broadcast %cst_73 : f32 to vector<1x96xf32>
    %292 = arith.addf %290, %291 : vector<1x96xf32>
    %293 = vector.extract_strided_slice %284 {offsets = [0, 96], sizes = [1, 32], strides = [1, 1]} : vector<1x128xf32> to vector<1x32xf32>
    %294 = math.tanh %293 : vector<1x32xf32>
    %295 = vector.extract_strided_slice %292 {offsets = [0, 0], sizes = [1, 32], strides = [1, 1]} : vector<1x96xf32> to vector<1x32xf32>
    %296 = vector.extract_strided_slice %292 {offsets = [0, 32], sizes = [1, 32], strides = [1, 1]} : vector<1x96xf32> to vector<1x32xf32>
    %297 = vector.extract_strided_slice %292 {offsets = [0, 64], sizes = [1, 32], strides = [1, 1]} : vector<1x96xf32> to vector<1x32xf32>
    %298 = arith.mulf %296, %255 : vector<1x32xf32>
    %299 = arith.mulf %295, %294 : vector<1x32xf32>
    %300 = arith.addf %298, %299 : vector<1x32xf32>
    %301 = math.tanh %300 : vector<1x32xf32>
    %302 = arith.mulf %297, %301 : vector<1x32xf32>
    %303 = arith.truncf %302 : vector<1x32xf32> to vector<1x32xbf16>
    %cst_74 = arith.constant dense<0.000000e+00> : vector<1x256xf32>
    %304 = tpu.matmul %303, %2, %cst_74 {dimension_numbers = #tpu.dot_dimension_numbers<[1], [0], [0], [1], [0, 0, 1, 1], [], []>} : vector<1x32xbf16>, vector<32x256xbf16>, vector<1x256xf32> -> vector<1x256xf32>
    %305 = arith.addf %281, %304 : vector<1x256xf32>
    %306 = vector.extract_strided_slice %305 {offsets = [0, 0], sizes = [1, 192], strides = [1, 1]} : vector<1x256xf32> to vector<1x192xf32>
    %cst_75 = arith.constant 5.000000e-01 : f32
    %307 = vector.broadcast %cst_75 : f32 to vector<1x192xf32>
    %308 = arith.mulf %307, %306 : vector<1x192xf32>
    %309 = math.tanh %308 : vector<1x192xf32>
    %cst_76 = arith.constant 5.000000e-01 : f32
    %310 = vector.broadcast %cst_76 : f32 to vector<1x192xf32>
    %311 = arith.mulf %310, %309 : vector<1x192xf32>
    %cst_77 = arith.constant 5.000000e-01 : f32
    %312 = vector.broadcast %cst_77 : f32 to vector<1x192xf32>
    %313 = arith.addf %311, %312 : vector<1x192xf32>
    %314 = vector.extract_strided_slice %305 {offsets = [0, 192], sizes = [1, 64], strides = [1, 1]} : vector<1x256xf32> to vector<1x64xf32>
    %315 = math.tanh %314 : vector<1x64xf32>
    %316 = vector.extract_strided_slice %313 {offsets = [0, 0], sizes = [1, 64], strides = [1, 1]} : vector<1x192xf32> to vector<1x64xf32>
    %317 = vector.extract_strided_slice %313 {offsets = [0, 64], sizes = [1, 64], strides = [1, 1]} : vector<1x192xf32> to vector<1x64xf32>
    %318 = vector.extract_strided_slice %313 {offsets = [0, 128], sizes = [1, 64], strides = [1, 1]} : vector<1x192xf32> to vector<1x64xf32>
    %319 = arith.mulf %317, %276 : vector<1x64xf32>
    %320 = arith.mulf %316, %315 : vector<1x64xf32>
    %321 = arith.addf %319, %320 : vector<1x64xf32>
    %322 = math.tanh %321 : vector<1x64xf32>
    %323 = arith.mulf %318, %322 : vector<1x64xf32>
    %324 = arith.truncf %323 : vector<1x64xf32> to vector<1x64xbf16>
    %cst_78 = arith.constant dense<0.000000e+00> : vector<1x256xf32>
    %325 = tpu.matmul %324, %3, %cst_78 {dimension_numbers = #tpu.dot_dimension_numbers<[1], [0], [0], [1], [0, 0, 1, 1], [], []>} : vector<1x64xbf16>, vector<64x256xbf16>, vector<1x256xf32> -> vector<1x256xf32>
    %326 = arith.addf %4, %325 : vector<1x256xf32>
    %327 = arith.truncf %302 : vector<1x32xf32> to vector<1x32xbf16>
    %cst_79 = arith.constant dense<0.000000e+00> : vector<1x128xf32>
    %328 = tpu.matmul %327, %1, %cst_79 {dimension_numbers = #tpu.dot_dimension_numbers<[1], [0], [0], [1], [0, 0, 1, 1], [], []>} : vector<1x32xbf16>, vector<32x128xbf16>, vector<1x128xf32> -> vector<1x128xf32>
    %329 = arith.addf %8, %328 : vector<1x128xf32>
    %330 = vector.extract_strided_slice %329 {offsets = [0, 0], sizes = [1, 96], strides = [1, 1]} : vector<1x128xf32> to vector<1x96xf32>
    %cst_80 = arith.constant 5.000000e-01 : f32
    %331 = vector.broadcast %cst_80 : f32 to vector<1x96xf32>
    %332 = arith.mulf %331, %330 : vector<1x96xf32>
    %333 = math.tanh %332 : vector<1x96xf32>
    %cst_81 = arith.constant 5.000000e-01 : f32
    %334 = vector.broadcast %cst_81 : f32 to vector<1x96xf32>
    %335 = arith.mulf %334, %333 : vector<1x96xf32>
    %cst_82 = arith.constant 5.000000e-01 : f32
    %336 = vector.broadcast %cst_82 : f32 to vector<1x96xf32>
    %337 = arith.addf %335, %336 : vector<1x96xf32>
    %338 = vector.extract_strided_slice %329 {offsets = [0, 96], sizes = [1, 32], strides = [1, 1]} : vector<1x128xf32> to vector<1x32xf32>
    %339 = math.tanh %338 : vector<1x32xf32>
    %340 = vector.extract_strided_slice %337 {offsets = [0, 0], sizes = [1, 32], strides = [1, 1]} : vector<1x96xf32> to vector<1x32xf32>
    %341 = vector.extract_strided_slice %337 {offsets = [0, 32], sizes = [1, 32], strides = [1, 1]} : vector<1x96xf32> to vector<1x32xf32>
    %342 = vector.extract_strided_slice %337 {offsets = [0, 64], sizes = [1, 32], strides = [1, 1]} : vector<1x96xf32> to vector<1x32xf32>
    %343 = arith.mulf %341, %300 : vector<1x32xf32>
    %344 = arith.mulf %340, %339 : vector<1x32xf32>
    %345 = arith.addf %343, %344 : vector<1x32xf32>
    %346 = math.tanh %345 : vector<1x32xf32>
    %347 = arith.mulf %342, %346 : vector<1x32xf32>
    %348 = arith.truncf %347 : vector<1x32xf32> to vector<1x32xbf16>
    %cst_83 = arith.constant dense<0.000000e+00> : vector<1x256xf32>
    %349 = tpu.matmul %348, %2, %cst_83 {dimension_numbers = #tpu.dot_dimension_numbers<[1], [0], [0], [1], [0, 0, 1, 1], [], []>} : vector<1x32xbf16>, vector<32x256xbf16>, vector<1x256xf32> -> vector<1x256xf32>
    %350 = arith.addf %326, %349 : vector<1x256xf32>
    %351 = vector.extract_strided_slice %350 {offsets = [0, 0], sizes = [1, 192], strides = [1, 1]} : vector<1x256xf32> to vector<1x192xf32>
    %cst_84 = arith.constant 5.000000e-01 : f32
    %352 = vector.broadcast %cst_84 : f32 to vector<1x192xf32>
    %353 = arith.mulf %352, %351 : vector<1x192xf32>
    %354 = math.tanh %353 : vector<1x192xf32>
    %cst_85 = arith.constant 5.000000e-01 : f32
    %355 = vector.broadcast %cst_85 : f32 to vector<1x192xf32>
    %356 = arith.mulf %355, %354 : vector<1x192xf32>
    %cst_86 = arith.constant 5.000000e-01 : f32
    %357 = vector.broadcast %cst_86 : f32 to vector<1x192xf32>
    %358 = arith.addf %356, %357 : vector<1x192xf32>
    %359 = vector.extract_strided_slice %350 {offsets = [0, 192], sizes = [1, 64], strides = [1, 1]} : vector<1x256xf32> to vector<1x64xf32>
    %360 = math.tanh %359 : vector<1x64xf32>
    %361 = vector.extract_strided_slice %358 {offsets = [0, 0], sizes = [1, 64], strides = [1, 1]} : vector<1x192xf32> to vector<1x64xf32>
    %362 = vector.extract_strided_slice %358 {offsets = [0, 64], sizes = [1, 64], strides = [1, 1]} : vector<1x192xf32> to vector<1x64xf32>
    %363 = vector.extract_strided_slice %358 {offsets = [0, 128], sizes = [1, 64], strides = [1, 1]} : vector<1x192xf32> to vector<1x64xf32>
    %364 = arith.mulf %362, %321 : vector<1x64xf32>
    %365 = arith.mulf %361, %360 : vector<1x64xf32>
    %366 = arith.addf %364, %365 : vector<1x64xf32>
    %367 = math.tanh %366 : vector<1x64xf32>
    %368 = arith.mulf %363, %367 : vector<1x64xf32>
    %369 = tpu.concatenate %53, %98, %143, %188, %233, %278, %323, %368 in 0 : vector<1x64xf32>, vector<1x64xf32>, vector<1x64xf32>, vector<1x64xf32>, vector<1x64xf32>, vector<1x64xf32>, vector<1x64xf32>, vector<1x64xf32> -> vector<8x64xf32>
    %c0_87 = arith.constant 0 : index
    %c0_88 = arith.constant 0 : index
    %370 = vector.load %arg7[%c0_87, %c0_88] : memref<1x64xf32, #tpu.memory_space<vmem>>, vector<1x64xf32>
    %371 = vector.broadcast %370 : vector<1x64xf32> to vector<8x64xf32>
    %372 = arith.mulf %369, %371 : vector<8x64xf32>
    %cst_89 = arith.constant dense<0.000000e+00> : vector<8xf32>
    %373 = vector.multi_reduction <add>, %372, %cst_89 [1] : vector<8x64xf32> to vector<8xf32>
    %374 = vector.shape_cast %373 : vector<8xf32> to vector<8x1xf32>
    %c0_90 = arith.constant 0 : index
    %c0_91 = arith.constant 0 : index
    %375 = vector.load %arg8[%c0_90, %c0_91] : memref<1x1xf32, #tpu.memory_space<vmem>>, vector<1x1xf32>
    %376 = vector.broadcast %375 : vector<1x1xf32> to vector<8x1xf32>
    %377 = arith.addf %374, %376 : vector<8x1xf32>
    %c0_92 = arith.constant 0 : index
    %c0_93 = arith.constant 0 : index
    %378 = vector.load %arg9[%c0_92, %c0_93] : memref<8x1xf32, #tpu.memory_space<vmem>>, vector<8x1xf32>
    tpu.vector_store %arg9[%c0_92, %c0_93], %377 {strides = array<i32>} : memref<8x1xf32, #tpu.memory_space<vmem>>, vector<8x1xf32>,
    return
  }
}

</mosaic_0001>

<bundles_post_ra>
// kernel: tpu_custom_call.1
= control target key start
LH: loop header
LB: loop body
LE: loop exit
PB: predicated region body
PF: predicated region fallthrough
CT: control target
= control target key end

     0   :  { %s2973_s0 = inlined_call_operand.vmem [shape: f32[1,32], index: 0, kind: input, shape index: {}]   ;;  %s2974_s1 = inlined_call_operand.hbm [shape: f32[32,128], index: 1, kind: input, shape index: {}]   ;;  %s2975_s2 = inlined_call_operand.hbm [shape: bf16[32,128], index: 2, kind: input, shape index: {}]   ;;  %s2976_s3 = inlined_call_operand.vmem [shape: f32[1,128], index: 3, kind: input, shape index: {}]   ;;  %s2977_s4 = inlined_call_operand.hbm [shape: bf16[32,256], index: 4, kind: input, shape index: {}]   ;;  %s2978_s5 = inlined_call_operand.hbm [shape: bf16[64,256], index: 5, kind: input, shape index: {}]   ;;  %s2979_s6 = inlined_call_operand.vmem [shape: f32[1,256], index: 6, kind: input, shape index: {}]   ;;  %s2980_s7 = inlined_call_operand.vmem [shape: f32[1,64], index: 7, kind: input, shape index: {}]   ;;  %s2981_s8 = inlined_call_operand.<no memory space> [shape: f32[1,1], index: 8, kind: input, shape index: {}]   ;;  %s2982_s9 = inlined_call_operand.vmem [shape: f32[8,1], index: 9, kind: output, shape index: {}]  }
   0x1   :  { %v14_v0 = vstv %s2981_s8 }
   0x2   :  { %15 = vst [vmem:[#allocation2] sm:$0x1] %v14_v0 }
   0x3   :  { %16 = vsyncpa [#allocation4], 0 }
   0x4   :  { %17 = vsyncpa [#allocation6], 0 }
   0x5   :  { %18 = vsyncpa [#allocation9], 0  ;;  %s2423_s11 = smov [#allocation5]   ;;  %s2329_s15 = scalar_lea.hbm %s2975_s2, 256 }
   0x6   :  { %s38_s12 = sshll.u32 %s2423_s11, 4  ;;  %p2330_p0 = scmp.ne.s32.totalorder %s2975_s2, %s2329_s15  ;;  %s39_s12 = int_to_ptr.vmem [resolvable:$true] %s38_s12 }
   0x7   :  { %p2333_p1 = scmp.lt.u32.totalorder %s2329_s15, %s2975_s2 }
   0x9   :  { %p2335_p2 = pnand %p2333_p1, %p2330_p0 }
   0xb   :  { %2338 = shalt.err (!%p2335_p2)
}
   0xc   :  { %s2339_s8 = scalar_lea.vmem %s39_s12, 256  ;;  %p2344_p4 = scmp.lt.s32.totalorder %s39_s12, %s39_s12 }
   0xd   :  { %p2340_p3 = scmp.ne.s32.totalorder %s39_s12, %s2339_s8  ;;  %p2345_p5 = scmp.lt.s32.totalorder %s2339_s8, %s2339_s8 }
   0xf   :  { %p2346_p6 = por %p2345_p5, %p2344_p4 }
  0x11   :  { %p2347_p7 = pnand %p2346_p6, %p2340_p3 }
  0x13   :  { %2350 = shalt.err (!%p2347_p7)
}
  0x14   :  { %s2424_s20 = smov 64   ;;  %s2425_s21 = smov 4  }
  0x15   :  { %44 = dma.hbm_to_vmem [thread:$0]  %s2975_s2, 256, %s39_s12, [#allocation6], %s2424_s20, %s2424_s20, %s2425_s21  }
  0x16   :  { %s2426_s24 = smov [#allocation3]   ;;  %s2351_s28 = scalar_lea.hbm %s2974_s1, 512 }
  0x17   :  { %s26_s25 = sshll.u32 %s2426_s24, 4  ;;  %p2352_p8 = scmp.ne.s32.totalorder %s2974_s1, %s2351_s28  ;;  %s27_s25 = int_to_ptr.vmem [resolvable:$true] %s26_s25 }
  0x18   :  { %p2355_p9 = scmp.lt.u32.totalorder %s2351_s28, %s2974_s1 }
  0x1a   :  { %p2357_p10 = pnand %p2355_p9, %p2352_p8 }
  0x1c   :  { %2360 = shalt.err (!%p2357_p10)
}
  0x1d   :  { %s2361_s13 = scalar_lea.vmem %s27_s25, 512  ;;  %p2366_p12 = scmp.lt.s32.totalorder %s27_s25, %s27_s25 }
  0x1e   :  { %p2362_p11 = scmp.ne.s32.totalorder %s27_s25, %s2361_s13  ;;  %p2367_p13 = scmp.lt.s32.totalorder %s2361_s13, %s2361_s13 }
  0x20   :  { %p2368_p0 = por %p2367_p13, %p2366_p12 }
  0x22   :  { %p2369_p1 = pnand %p2368_p0, %p2362_p11 }
  0x24   :  { %2372 = shalt.err (!%p2369_p1)
}
  0x25   :  { %s2427_s2 = smov 128   ;;  %s2428_s12 = smov 8  }
  0x26   :  { %32 = dma.hbm_to_vmem [thread:$0]  %s2974_s1, 512, %s27_s25, [#allocation4], %s2427_s2, %s2427_s2, %s2428_s12  }
  0x27   :  { %s2429_s16 = smov [#allocation7]   ;;  %s2430_s18 = smov [#allocation8]  }
  0x28   :  { %s52_s17 = sshll.u32 %s2429_s16, 4  ;;  %s64_s19 = sshll.u32 %s2430_s18, 4  ;;  %s53_s17 = int_to_ptr.vmem [resolvable:$true] %s52_s17  ;;  %s2519_s19 = int_to_ptr.vmem [resolvable:$true] %s64_s19 }
  0x29   :  { %s2373_s22 = scalar_lea.hbm %s2977_s4, 512 }
  0x2a   :  { %p2374_p2 = scmp.ne.s32.totalorder %s2977_s4, %s2373_s22  ;;  %p2377_p3 = scmp.lt.u32.totalorder %s2373_s22, %s2977_s4 }
  0x2c   :  { %p2379_p4 = pnand %p2377_p3, %p2374_p2 }
  0x2e   :  { %2382 = shalt.err (!%p2379_p4)
}
  0x2f   :  { %s2383_s1 = scalar_lea.vmem %s53_s17, 512  ;;  %p2388_p6 = scmp.lt.s32.totalorder %s53_s17, %s53_s17 }
  0x30   :  { %p2384_p5 = scmp.ne.s32.totalorder %s53_s17, %s2383_s1  ;;  %p2389_p7 = scmp.lt.s32.totalorder %s2383_s1, %s2383_s1 }
  0x32   :  { %p2390_p8 = por %p2389_p7, %p2388_p6 }
  0x34   :  { %p2391_p9 = pnand %p2390_p8, %p2384_p5 }
  0x36   :  { %2394 = shalt.err (!%p2391_p9)
}
  0x37   :  { %58 = dma.hbm_to_vmem [thread:$0]  %s2977_s4, 512, %s53_s17, [#allocation6], %s2427_s2, %s2427_s2, %s2428_s12  }
  0x38   :  { %s2395_s10 = scalar_lea.hbm %s2978_s5, 1024 }
  0x39   :  { %p2396_p10 = scmp.ne.s32.totalorder %s2978_s5, %s2395_s10  ;;  %p2399_p11 = scmp.lt.u32.totalorder %s2395_s10, %s2978_s5 }
  0x3b   :  { %p2401_p12 = pnand %p2399_p11, %p2396_p10 }
  0x3d   :  { %2404 = shalt.err (!%p2401_p12)
}
  0x3e   :  { %s2405_s16 = scalar_lea.vmem %s2519_s19, 1024  ;;  %p2410_p0 = scmp.lt.s32.totalorder %s2519_s19, %s2519_s19 }
  0x3f   :  { %p2406_p13 = scmp.ne.s32.totalorder %s2519_s19, %s2405_s16  ;;  %p2411_p1 = scmp.lt.s32.totalorder %s2405_s16, %s2405_s16 }
  0x41   :  { %p2412_p2 = por %p2411_p1, %p2410_p0 }
  0x43   :  { %p2413_p3 = pnand %p2412_p2, %p2406_p13 }
  0x45   :  { %2416 = shalt.err (!%p2413_p3)
}
  0x46   :  { %70 = dma.hbm_to_vmem [thread:$0]  %s2978_s5, 1024, %s2519_s19, [#allocation9], %s2427_s2, %s2427_s2, %s2428_s12  }
  0x47   :  { %2417 = dma.done.wait [#allocation4], 512  }
  0x48   :  { %2418 = vsyncadd [#allocation4], 4294966784 }
  0x49   :  { %2419 = dma.done.wait [#allocation6], 768  }
  0x4a   :  { %2420 = vsyncadd [#allocation6], 4294966528 }
  0x4b   :  { %2421 = dma.done.wait [#allocation9], 1024  }
  0x4c   :  { %2422 = vsyncadd [#allocation9], 4294966272  ;;  %v2431_v1 = vmov 0.0|0.0   ;;  %v2432_v2 = vmov 0.0   ;;  %vm2433_vm0 = vmmov 0   ;;  %v108_v3 = vld [vmem:[#allocation3] sm:$0xff]  ;;  %v339_v60 = vlaneseq }
  0x4d   :  { %2186 = vmatprep.subr.bf16.mxu0 %v2431_v1  ;;  %2122 = vmatprep.subr.bf16.mxu1 %v2432_v2  ;;  %v109_v4 = vld [vmem:[#allocation3 + $0x8] sm:$0xff]  ;;  %v2561_v6 = vld [vmem:[#allocation5] sm:$0xff]   ;;  %v110_v7 = vld [vmem:[#allocation3 + $0x10] sm:$0xff]  ;;  %vm113_vm1 = vcmask 261120   ;;  %v2434_v12 = vmov 0   ;;  %vm419_vm2 = vcmask 523264  }
  0x4e   :  { %2119 = vmatprep.mubr.msk.f32.mxu0 %vm2433_vm0, %v2432_v2  ;;  %2126 = vmatprep.mubr.msk.bf16.mxu1 %vm2433_vm0, %v2432_v2  ;;  %v2187_v5 = vpack.c.bf16 %v109_v4, %v108_v3  ;;  %v111_v8 = vld [vmem:[#allocation3 + $0x18] sm:$0xff]  ;;  %v2564_v10 = vld [vmem:[#allocation5 + $0x8] sm:$0xff]   ;;  %v2436_v58 = vmov 1966171168   ;;  %v2614_v63 = vshrl.u32 %v339_v60, 7  ;;  %vm2001_vm3 = vcmask 1040384  }
  0x4f   :  { %2123 = vmatpush3.bf16.msra.mxu1 %v2561_v6  ;;  %v2190_v9 = vpack.c.bf16 %v111_v8, %v110_v7  ;;  %v90_v11 = vld [vmem:[%s2973_s0] sm:$0x1]  ;;  %s2435_s0 = smov 32   ;;  %v2585_v33 = vld [vmem:[#allocation7] ss:$8 sps:$4 sm:$0xff]   ;;  %v337_v59 = vunpack.c.l.s4 %v2436_v58  ;;  %vm2003_vm4 = vcmask 1041408  }
  0x50   :  { %2188 = vmatpush3.bf16.msra.mxu0 %v2187_v5  ;;  %2124 = vmatprep.subr.bf16.mxu1 %v2432_v2  ;;  %v112_v13 = vld [vmem:[%s2976_s3] sm:$0x1]  ;;  %v2587_v34 = vld [vmem:[#allocation7 + $0x14] ss:$8 sps:$4 sm:$0xff]   ;;  %v2591_v35 = vld [vmem:[#allocation7 + $0x10] ss:$8 sps:$4 sm:$0xff]  }
  0x51   :  { %2189 = vmatprep.subr.bf16.mxu0 %v2431_v1  ;;  %v2583_v32 = vld [vmem:[#allocation7 + $0x4] ss:$8 sps:$4 sm:$0xff]   ;;  %v338_v62 = vunpack.c.0.s8 %v337_v59  ;;  %vm2005_vm5 = vcmask 1042432   ;;  %vm2007_vm6 = vcmask 1043456   ;;  %vm2009_vm7 = vcmask 1044480  }
  0x52   :  { %v2627_v8 = vld [vmem:[%s2979_s6] sm:$0x3]  ;;  %vm2011_vm8 = vcmask 1045504   ;;  %vm2013_vm9 = vcmask 1046528   ;;  %vm2034_vm10 = vcmask 7168  }
  0x53   :  { %2125 = vmatpush3.bf16.msra.mxu1 %v2564_v10  ;;  %v2620_v3 = vsub.s32 %v338_v62, %v2614_v63 }
  0x54   :  { %2191 = vmatpush3.bf16.msra.mxu0 %v2190_v9 }
  0x55   :  { %292 = vmatprep.subr.bf16.mxu0 %v2583_v32 }
  0x56   :  { %2127 = vmatmul.mubr.bf16.vlgmr.msra.gmra.mrb[0].mxu1 %v2434_v12 }
  0x57   :  { %2120 = vmatmul.mubr.msk.f32.vlgmr.msra.gmra.mrb[0].mxu0 %vm113_vm1, %v90_v11  ;;  %455 = vmatprep.mubr.bf16.mxu1 %v2434_v12 }
  0x58   :  { %324 = vmatprep.mubr.bf16.mxu0 %v2434_v12  ;;  %293 = vmatpush1.bf16.msra.mxu0 %v2585_v33 }
  0x59   :  { %294 = vmatprep.subr.bf16.mxu0 %v2587_v34 }
  0x5c   :  { %295 = vmatpush1.bf16.msra.mxu0 %v2591_v35 }
  0x5d   :  { %2130 = vmatprep.subr.bf16.mxu0 %v2432_v2 }
 0x129   :  { %v236_v15 = vpop.f32.mrb[0].mxu1 }
 0x12a   :  { %v183_v14 = vpop.f32.mrb[0].mxu0  ;;  %v2128_v18 = vpop.f32.mrb[1].mxu1 }
 0x12b   :  { %v2578_v16 = vadd.f32 %v183_v14, %v112_v13  ;;  %v2121_v17 = vpop.f32.mrb[1].mxu0  ;;  %v239_v19 = vpop.f32.mrb[2].mxu1 }
 0x12c   :  { %v2129_v21 = vpop.f32.mrb[3].mxu1 }
 0x12d   :  { %v242_v20 = vadd.f32 %v236_v15, %v2578_v16 }
 0x12f   :  { %2226 = vtanh.f32 %v242_v20  ;;  %v243_v23 = vmul.f32 0.5, %v242_v20 }
 0x131   :  { %2228 = vtanh.f32 %v243_v23 }
 0x139   :  { %v2227_v22 = vpop.eup %2226 }
 0x13a   :  { %250 = vrot.lane.b32.xlu0 %v2227_v22, %s2435_s0 }
 0x13b   :  { %v2229_v24 = vpop.eup %2228 }
 0x13c   :  { %v245_v25 = vmul.f32 0.5, %v2229_v24  ;;  %v2634_v24 = vld [vmem:[#allocation8 + $0x4] ss:$8 sps:$4 sm:$0xff]  }
 0x13d   :  { %423 = vmatprep.subr.bf16.mxu1 %v2634_v24 }
 0x13e   :  { %v246_v26 = vadd.f32 0.5, %v245_v25  ;;  %v2636_v25 = vld [vmem:[#allocation8] ss:$8 sps:$4 sm:$0xff]  }
 0x13f   :  { %424 = vmatpush1.bf16.msra.mxu1 %v2636_v25 }
 0x140   :  { %v248_v29 = vmul.f32 0.0, %v246_v26 }
 0x1ac   :  { %v251_v27 = vpop.permute.xlu0 %250 }
 0x1ad   :  { %v253_v28 = vmul.f32 %v251_v27, %v246_v26  ;;  %v2642_v27 = vld [vmem:[#allocation8 + $0x10] ss:$8 sps:$4 sm:$0xff]  }
 0x1af   :  { %255 = vrot.lane.b32.xlu0 %v253_v28, %s2435_s0  ;;  %v2645_v28 = vld [vmem:[#allocation8 + $0x24] ss:$8 sps:$4 sm:$0xff]  }
 0x221   :  { %v256_v30 = vpop.permute.xlu0 %255 }
 0x222   :  { %v258_v31 = vadd.f32 %v256_v30, %v248_v29  ;;  %v2648_v29 = vld [vmem:[#allocation8 + $0x20] ss:$8 sps:$4 sm:$0xff]  }
 0x224   :  { %2230 = vtanh.f32 %v258_v31 }
 0x22e   :  { %v2231_v36 = vpop.eup %2230 }
 0x22f   :  { %261 = vrot.lane.b32.xlu1 %v2231_v36, %s2435_s0 }
 0x2a1   :  { %v262_v37 = vpop.permute.xlu1 %261 }
 0x2a2   :  { %v264_v38 = vmul.f32 %v262_v37, %v246_v26  ;;  %v2638_v26 = vld [vmem:[#allocation8 + $0x14] ss:$8 sps:$4 sm:$0xff]  }
 0x2a3   :  { %425 = vmatprep.subr.bf16.mxu1 %v2638_v26  ;;  %v2664_v37 = vld [vmem:[#allocation8 + $0x34] ss:$8 sps:$4 sm:$0xff]  }
 0x2a4   :  { %v265_v39 = vpack.c.bf16 %v264_v38, %v264_v38  ;;  %426 = vmatpush1.bf16.msra.mxu1 %v2642_v27 }
 0x2a5   :  { %427 = vmatprep.subr.bf16.mxu1 %v2645_v28 }
 0x2a6   :  { %267 = vrot.lane.b32.xlu1 %v265_v39, %s2424_s20  ;;  %v2669_v39 = vld [vmem:[#allocation8 + $0x30] ss:$8 sps:$4 sm:$0xff]  }
 0x2a8   :  { %428 = vmatpush1.bf16.msra.mxu1 %v2648_v29 }
 0x2a9   :  { %429 = vmatprep.subr.bf16.mxu1 %v2664_v37 }
 0x2ac   :  { %430 = vmatpush1.bf16.msra.mxu1 %v2669_v39 }
 0x2ad   :  { %643 = vmatprep.subr.bf16.mxu1 %v2634_v24 }
 0x318   :  { %v268_v40 = vpop.permute.xlu1 %267 }
 0x319   :  { %2050 = vmatmul.mubr.msk.bf16.vlgmr.msra.gmra.mrb[4].mxu0 %vm113_vm1, %v268_v40 }
 0x31a   :  { %2131 = vmatpush3.bf16.msra.mxu0 %v2561_v6  ;;  %2134 = vmatprep.mubr.msk.bf16.mxu0 %vm2433_vm0, %v2432_v2 }
 0x31b   :  { %2132 = vmatprep.subr.bf16.mxu0 %v2432_v2 }
 0x31e   :  { %2133 = vmatpush3.bf16.msra.mxu0 %v2564_v10 }
 0x31f   :  { %553 = vmatprep.subr.bf16.mxu0 %v2583_v32 }
 0x321   :  { %2135 = vmatmul.mubr.msk.bf16.vlgmr.msra.gmra.mrb[8].mxu0 %vm113_vm1, %v268_v40 }
 0x322   :  { %554 = vmatpush1.bf16.msra.mxu0 %v2585_v33  ;;  %585 = vmatprep.mubr.bf16.mxu0 %v2434_v12 }
 0x323   :  { %555 = vmatprep.subr.bf16.mxu0 %v2587_v34 }
 0x326   :  { %556 = vmatpush1.bf16.msra.mxu0 %v2591_v35 }
 0x327   :  { %2138 = vmatprep.subr.bf16.mxu0 %v2432_v2 }
 0x3ec   :  { %v326_v41 = vpop.f32.mrb[4].mxu0 }
 0x3ed   :  { %v328_v42 = vpop.f32.mrb[5].mxu0 }
 0x3ee   :  { %v335_v43 = vcombine.low %v326_v41, %v328_v42  ;;  %v330_v44 = vpop.f32.mrb[6].mxu0 }
 0x3ef   :  { %v331_v45 = vpop.f32.mrb[7].mxu0 }
 0x3f0   :  { %v342_v4 = vrot.slane %v335_v43, %v2620_v3 }
 0x3f2   :  { %v349_v5 = vrot.slane %v342_v4, %v2620_v3 }
 0x3f4   :  { %v517_v46 = vpop.f32.mrb[8].mxu0  ;;  %v351_v9 = vadd.f32 %v349_v5, %v2627_v8 }
 0x3f5   :  { %v523_v47 = vadd.f32 %v517_v46, %v2578_v16  ;;  %v2136_v48 = vpop.f32.mrb[9].mxu0 }
 0x3f6   :  { %v520_v49 = vpop.f32.mrb[10].mxu0  ;;  %v352_v11 = vmul.f32 0.5, %v351_v9 }
 0x3f7   :  { %2232 = vtanh.f32 %v523_v47  ;;  %v2137_v50 = vpop.f32.mrb[11].mxu0  ;;  %v524_v52 = vmul.f32 0.5, %v523_v47 }
 0x3f9   :  { %2234 = vtanh.f32 %v524_v52 }
 0x401   :  { %v2233_v51 = vpop.eup %2232 }
 0x402   :  { %531 = vrot.lane.b32.xlu0 %v2233_v51, %s2435_s0 }
 0x403   :  { %v2235_v53 = vpop.eup %2234 }
 0x404   :  { %v526_v54 = vmul.f32 0.5, %v2235_v53 }
 0x406   :  { %v527_v55 = vadd.f32 0.5, %v526_v54 }
 0x408   :  { %v529_v61 = vmul.f32 %v527_v55, %v258_v31 }
 0x474   :  { %v532_v56 = vpop.permute.xlu0 %531 }
 0x475   :  { %v534_v57 = vmul.f32 %v532_v56, %v527_v55 }
 0x477   :  { %536 = vrot.lane.b32.xlu1 %v534_v57, %s2435_s0 }
 0x4e9   :  { %v537_v0 = vpop.permute.xlu1 %536 }
 0x4ea   :  { %v2616_v1 = vadd.f32 %v537_v0, %v529_v61 }
 0x4ec   :  { %2236 = vtanh.f32 %v2616_v1 }
 0x4ed   :  { %2238 = vtanh.f32 %v352_v11 }
 0x4f6   :  { %v2237_v7 = vpop.eup %2236 }
 0x4f7   :  { %542 = vrot.lane.b32.xlu0 %v2237_v7, %s2435_s0  ;;  %v2239_v19 = vpop.eup %2238 }
 0x4f8   :  { %v354_v20 = vmul.f32 0.5, %v2239_v19 }
 0x4fa   :  { %v355_v21 = vadd.f32 0.5, %v354_v20 }
 0x4fb   :  { %357 = vrot.lane.b32.xlu0 %v351_v9, %s2424_s20 }
 0x4fc   :  { %v362_v31 = vmul.f32 0.0, %v355_v21  ;;  %v371_v41 = vrot.slane %v355_v21, 1 }
 0x569   :  { %v543_v13 = vpop.permute.xlu0 %542 }
 0x56a   :  { %v545_v14 = vmul.f32 %v543_v13, %v527_v55 }
 0x56c   :  { %v546_v15 = vpack.c.bf16 %v545_v14, %v545_v14 }
 0x56d   :  { %v358_v17 = vpop.permute.xlu0 %357 }
 0x56e   :  { %v359_v18 = vrot.slane %v358_v17, 1  ;;  %548 = vrot.lane.b32.xlu1 %v546_v15, %s2424_s20 }
 0x570   :  { %2240 = vtanh.f32 %v359_v18 }
 0x57a   :  { %v2241_v22 = vpop.eup %2240 }
 0x57b   :  { %v363_v23 = vmul.f32 %v2241_v22, %v355_v21 }
 0x57d   :  { %365 = vrot.lane.b32.xlu1 %v363_v23, %s2424_s20 }
 0x5e0   :  { %v549_v30 = vpop.permute.xlu1 %548 }
 0x5e1   :  { %2061 = vmatmul.mubr.msk.bf16.vlgmr.msra.gmra.mrb[12].mxu0 %vm113_vm1, %v549_v30 }
 0x5e2   :  { %2139 = vmatpush3.bf16.msra.mxu0 %v2561_v6  ;;  %2142 = vmatprep.mubr.msk.bf16.mxu0 %vm2433_vm0, %v2432_v2 }
 0x5e3   :  { %2140 = vmatprep.subr.bf16.mxu0 %v2432_v2 }
 0x5e6   :  { %2141 = vmatpush3.bf16.msra.mxu0 %v2564_v10 }
 0x5e7   :  { %773 = vmatprep.subr.bf16.mxu0 %v2583_v32 }
 0x5e9   :  { %2143 = vmatmul.mubr.msk.bf16.vlgmr.msra.gmra.mrb[16].mxu0 %vm113_vm1, %v549_v30 }
 0x5ea   :  { %774 = vmatpush1.bf16.msra.mxu0 %v2585_v33  ;;  %805 = vmatprep.mubr.bf16.mxu0 %v2434_v12 }
 0x5eb   :  { %775 = vmatprep.subr.bf16.mxu0 %v2587_v34 }
 0x5ee   :  { %776 = vmatpush1.bf16.msra.mxu0 %v2591_v35 }
 0x5ef   :  { %v366_v36 = vpop.permute.xlu1 %365  ;;  %2146 = vmatprep.subr.bf16.mxu0 %v2432_v2 }
 0x5f0   :  { %v2667_v38 = vadd.f32 %v366_v36, %v362_v31 }
 0x5f2   :  { %2242 = vtanh.f32 %v2667_v38 }
 0x5fc   :  { %v2243_v40 = vpop.eup %2242 }
 0x5fd   :  { %374 = vrot.lane.b32.xlu1 %v2243_v40, %s2424_s20 }
 0x66f   :  { %v375_v42 = vpop.permute.xlu1 %374 }
 0x670   :  { %v2676_v43 = vmul.f32 %v375_v42, %v371_v41 }
 0x672   :  { %v378_v44 = vpack.c.bf16 %v2676_v43, %v2676_v43 }
 0x674   :  { %2059 = vmatmul.mubr.msk.bf16.vlgmr.msra.gmra.mrb[4].mxu1 %vm419_vm2, %v378_v44 }
 0x675   :  { %644 = vmatpush1.bf16.msra.mxu1 %v2636_v25  ;;  %675 = vmatprep.mubr.bf16.mxu1 %v2434_v12 }
 0x676   :  { %645 = vmatprep.subr.bf16.mxu1 %v2638_v26 }
 0x679   :  { %646 = vmatpush1.bf16.msra.mxu1 %v2642_v27 }
 0x67a   :  { %647 = vmatprep.subr.bf16.mxu1 %v2645_v28 }
 0x67d   :  { %648 = vmatpush1.bf16.msra.mxu1 %v2648_v29 }
 0x67e   :  { %649 = vmatprep.subr.bf16.mxu1 %v2664_v37 }
 0x681   :  { %650 = vmatpush1.bf16.msra.mxu1 %v2669_v39 }
 0x682   :  { %863 = vmatprep.subr.bf16.mxu1 %v2634_v24 }
 0x6b4   :  { %v587_v45 = vpop.f32.mrb[12].mxu0 }
 0x6b5   :  { %v589_v46 = vpop.f32.mrb[13].mxu0 }
 0x6b6   :  { %v596_v47 = vcombine.low %v587_v45, %v589_v46  ;;  %v591_v48 = vpop.f32.mrb[14].mxu0 }
 0x6b7   :  { %v592_v49 = vpop.f32.mrb[15].mxu0 }
 0x6b8   :  { %v603_v9 = vrot.slane %v596_v47, %v2620_v3 }
 0x6ba   :  { %v610_v15 = vrot.slane %v603_v9, %v2620_v3 }
 0x6bc   :  { %v737_v50 = vpop.f32.mrb[16].mxu0 }
 0x6bd   :  { %v743_v51 = vadd.f32 %v737_v50, %v2578_v16  ;;  %v2144_v52 = vpop.f32.mrb[17].mxu0 }
 0x6be   :  { %v740_v53 = vpop.f32.mrb[18].mxu0 }
 0x6bf   :  { %2244 = vtanh.f32 %v743_v51  ;;  %v2145_v54 = vpop.f32.mrb[19].mxu0  ;;  %v744_v56 = vmul.f32 0.5, %v743_v51 }
 0x6c1   :  { %2246 = vtanh.f32 %v744_v56 }
 0x6c9   :  { %v2245_v55 = vpop.eup %2244 }
 0x6ca   :  { %751 = vrot.lane.b32.xlu0 %v2245_v55, %s2435_s0 }
 0x6cb   :  { %v2247_v57 = vpop.eup %2246 }
 0x6cc   :  { %v746_v58 = vmul.f32 0.5, %v2247_v57 }
 0x6ce   :  { %v747_v59 = vadd.f32 0.5, %v746_v58 }
 0x6d0   :  { %v749_v18 = vmul.f32 %v747_v59, %v2616_v1 }
 0x73c   :  { %v752_v60 = vpop.permute.xlu0 %751 }
 0x73d   :  { %v754_v61 = vmul.f32 %v752_v60, %v747_v59 }
 0x73f   :  { %756 = vrot.lane.b32.xlu0 %v754_v61, %s2435_s0 }
 0x747   :  { %v457_v62 = vpop.f32.mrb[4].mxu1 }
 0x748   :  { %v459_v0 = vpop.f32.mrb[5].mxu1 }
 0x749   :  { %v466_v4 = vcombine.low %v457_v62, %v459_v0  ;;  %v461_v5 = vpop.f32.mrb[6].mxu1 }
 0x74a   :  { %v462_v7 = vpop.f32.mrb[7].mxu1 }
 0x74b   :  { %v473_v11 = vrot.slane %v466_v4, %v2620_v3 }
 0x74d   :  { %v480_v13 = vrot.slane %v473_v11, %v2620_v3 }
 0x74f   :  { %v482_v14 = vadd.f32 %v480_v13, %v2627_v8 }
 0x751   :  { %v612_v17 = vadd.f32 %v610_v15, %v482_v14 }
 0x753   :  { %v613_v22 = vmul.f32 0.5, %v612_v17 }
 0x7b1   :  { %v757_v19 = vpop.permute.xlu0 %756 }
 0x7b2   :  { %v2699_v20 = vadd.f32 %v757_v19, %v749_v18 }
 0x7b4   :  { %2248 = vtanh.f32 %v2699_v20 }
 0x7b5   :  { %2250 = vtanh.f32 %v613_v22 }
 0x7be   :  { %v2249_v21 = vpop.eup %2248 }
 0x7bf   :  { %762 = vrot.lane.b32.xlu1 %v2249_v21, %s2435_s0  ;;  %v2251_v1 = vpop.eup %2250 }
 0x7c0   :  { %v615_v41 = vmul.f32 0.5, %v2251_v1 }
 0x7c2   :  { %v616_v42 = vadd.f32 0.5, %v615_v41 }
 0x7c3   :  { %618 = vrot.lane.b32.xlu1 %v612_v17, %s2424_s20 }
 0x7c4   :  { %v623_v47 = vmul.f32 %v616_v42, %v2667_v38  ;;  %v632_v51 = vrot.slane %v616_v42, 1 }
 0x831   :  { %v763_v23 = vpop.permute.xlu1 %762 }
 0x832   :  { %v765_v30 = vmul.f32 %v763_v23, %v747_v59 }
 0x834   :  { %v766_v31 = vpack.c.bf16 %v765_v30, %v765_v30 }
 0x835   :  { %v619_v36 = vpop.permute.xlu1 %618 }
 0x836   :  { %v620_v40 = vrot.slane %v619_v36, 1  ;;  %768 = vrot.lane.b32.xlu0 %v766_v31, %s2424_s20 }
 0x838   :  { %2252 = vtanh.f32 %v620_v40 }
 0x842   :  { %v2253_v44 = vpop.eup %2252 }
 0x843   :  { %v624_v45 = vmul.f32 %v2253_v44, %v616_v42 }
 0x845   :  { %626 = vrot.lane.b32.xlu0 %v624_v45, %s2424_s20 }
 0x8a8   :  { %v769_v46 = vpop.permute.xlu0 %768 }
 0x8a9   :  { %2064 = vmatmul.mubr.msk.bf16.vlgmr.msra.gmra.mrb[20].mxu0 %vm113_vm1, %v769_v46 }
 0x8aa   :  { %2147 = vmatpush3.bf16.msra.mxu0 %v2561_v6  ;;  %2150 = vmatprep.mubr.msk.bf16.mxu0 %vm2433_vm0, %v2432_v2 }
 0x8ab   :  { %2148 = vmatprep.subr.bf16.mxu0 %v2432_v2 }
 0x8ae   :  { %2149 = vmatpush3.bf16.msra.mxu0 %v2564_v10 }
 0x8af   :  { %993 = vmatprep.subr.bf16.mxu0 %v2583_v32 }
 0x8b1   :  { %2151 = vmatmul.mubr.msk.bf16.vlgmr.msra.gmra.mrb[24].mxu0 %vm113_vm1, %v769_v46 }
 0x8b2   :  { %994 = vmatpush1.bf16.msra.mxu0 %v2585_v33  ;;  %1025 = vmatprep.mubr.bf16.mxu0 %v2434_v12 }
 0x8b3   :  { %995 = vmatprep.subr.bf16.mxu0 %v2587_v34 }
 0x8b6   :  { %996 = vmatpush1.bf16.msra.mxu0 %v2591_v35 }
 0x8b7   :  { %v627_v48 = vpop.permute.xlu0 %626  ;;  %2154 = vmatprep.subr.bf16.mxu0 %v2432_v2 }
 0x8b8   :  { %v2720_v49 = vadd.f32 %v627_v48, %v623_v47 }
 0x8ba   :  { %2254 = vtanh.f32 %v2720_v49 }
 0x8c4   :  { %v2255_v50 = vpop.eup %2254 }
 0x8c5   :  { %635 = vrot.lane.b32.xlu1 %v2255_v50, %s2424_s20 }
 0x937   :  { %v636_v52 = vpop.permute.xlu1 %635 }
 0x938   :  { %v2724_v53 = vmul.f32 %v636_v52, %v632_v51 }
 0x93a   :  { %v639_v54 = vpack.c.bf16 %v2724_v53, %v2724_v53 }
 0x93c   :  { %2062 = vmatmul.mubr.msk.bf16.vlgmr.msra.gmra.mrb[8].mxu1 %vm419_vm2, %v639_v54 }
 0x93d   :  { %864 = vmatpush1.bf16.msra.mxu1 %v2636_v25  ;;  %895 = vmatprep.mubr.bf16.mxu1 %v2434_v12 }
 0x93e   :  { %865 = vmatprep.subr.bf16.mxu1 %v2638_v26 }
 0x941   :  { %866 = vmatpush1.bf16.msra.mxu1 %v2642_v27 }
 0x942   :  { %867 = vmatprep.subr.bf16.mxu1 %v2645_v28 }
 0x945   :  { %868 = vmatpush1.bf16.msra.mxu1 %v2648_v29 }
 0x946   :  { %869 = vmatprep.subr.bf16.mxu1 %v2664_v37 }
 0x949   :  { %870 = vmatpush1.bf16.msra.mxu1 %v2669_v39 }
 0x94a   :  { %1083 = vmatprep.subr.bf16.mxu1 %v2634_v24 }
 0x97c   :  { %v807_v38 = vpop.f32.mrb[20].mxu0 }
 0x97d   :  { %v809_v55 = vpop.f32.mrb[21].mxu0 }
 0x97e   :  { %v816_v56 = vcombine.low %v807_v38, %v809_v55  ;;  %v811_v57 = vpop.f32.mrb[22].mxu0 }
 0x97f   :  { %v812_v58 = vpop.f32.mrb[23].mxu0 }
 0x980   :  { %v823_v22 = vrot.slane %v816_v56, %v2620_v3 }
 0x982   :  { %v830_v36 = vrot.slane %v823_v22, %v2620_v3 }
 0x984   :  { %v957_v59 = vpop.f32.mrb[24].mxu0 }
 0x985   :  { %v963_v60 = vadd.f32 %v957_v59, %v2578_v16  ;;  %v2152_v61 = vpop.f32.mrb[25].mxu0 }
 0x986   :  { %v960_v62 = vpop.f32.mrb[26].mxu0  ;;  %v2773_v61 = vsub.s32 0, %v2614_v63 }
 0x987   :  { %2256 = vtanh.f32 %v963_v60  ;;  %v2153_v0 = vpop.f32.mrb[27].mxu0  ;;  %v964_v5 = vmul.f32 0.5, %v963_v60 }
 0x988   :  { %v1963_v0 = vrot.slane %v2724_v53, %v2773_v61 }
 0x989   :  { %2258 = vtanh.f32 %v964_v5 }
 0x991   :  { %v2257_v4 = vpop.eup %2256 }
 0x992   :  { %971 = vrot.lane.b32.xlu0 %v2257_v4, %s2435_s0 }
 0x993   :  { %v2259_v7 = vpop.eup %2258 }
 0x994   :  { %v966_v9 = vmul.f32 0.5, %v2259_v7 }
 0x996   :  { %v967_v11 = vadd.f32 0.5, %v966_v9  ;;  %v2002_v9 = vsel %vm2001_vm3, %v2676_v43, %v1963_v0 }
 0x998   :  { %v969_v1 = vmul.f32 %v967_v11, %v2699_v20 }
 0xa04   :  { %v972_v13 = vpop.permute.xlu0 %971 }
 0xa05   :  { %v974_v14 = vmul.f32 %v972_v13, %v967_v11 }
 0xa07   :  { %976 = vrot.lane.b32.xlu1 %v974_v14, %s2435_s0 }
 0xa0f   :  { %v677_v15 = vpop.f32.mrb[8].mxu1 }
 0xa10   :  { %v679_v17 = vpop.f32.mrb[9].mxu1 }
 0xa11   :  { %v686_v18 = vcombine.low %v677_v15, %v679_v17  ;;  %v681_v19 = vpop.f32.mrb[10].mxu1 }
 0xa12   :  { %v682_v21 = vpop.f32.mrb[11].mxu1 }
 0xa13   :  { %v693_v23 = vrot.slane %v686_v18, %v2620_v3 }
 0xa15   :  { %v700_v30 = vrot.slane %v693_v23, %v2620_v3 }
 0xa17   :  { %v702_v31 = vadd.f32 %v700_v30, %v2627_v8 }
 0xa19   :  { %v832_v40 = vadd.f32 %v830_v36, %v702_v31 }
 0xa1b   :  { %v833_v45 = vmul.f32 0.5, %v832_v40 }
 0xa79   :  { %v977_v41 = vpop.permute.xlu1 %976 }
 0xa7a   :  { %v2747_v42 = vadd.f32 %v977_v41, %v969_v1 }
 0xa7c   :  { %2260 = vtanh.f32 %v2747_v42 }
 0xa7d   :  { %2262 = vtanh.f32 %v833_v45 }
 0xa86   :  { %v2261_v44 = vpop.eup %2260 }
 0xa87   :  { %982 = vrot.lane.b32.xlu0 %v2261_v44, %s2435_s0  ;;  %v2263_v20 = vpop.eup %2262 }
 0xa88   :  { %v835_v52 = vmul.f32 0.5, %v2263_v20 }
 0xa8a   :  { %v836_v54 = vadd.f32 0.5, %v835_v52 }
 0xa8b   :  { %838 = vrot.lane.b32.xlu0 %v832_v40, %s2424_s20 }
 0xa8c   :  { %v843_v57 = vmul.f32 %v836_v54, %v2720_v49  ;;  %v852_v62 = vrot.slane %v836_v54, 1 }
 0xaf9   :  { %v983_v46 = vpop.permute.xlu0 %982 }
 0xafa   :  { %v985_v47 = vmul.f32 %v983_v46, %v967_v11 }
 0xafc   :  { %v986_v48 = vpack.c.bf16 %v985_v47, %v985_v47 }
 0xafd   :  { %v839_v50 = vpop.permute.xlu0 %838 }
 0xafe   :  { %v840_v51 = vrot.slane %v839_v50, 1  ;;  %988 = vrot.lane.b32.xlu1 %v986_v48, %s2424_s20 }
 0xb00   :  { %2264 = vtanh.f32 %v840_v51 }
 0xb0a   :  { %v2265_v38 = vpop.eup %2264 }
 0xb0b   :  { %v844_v55 = vmul.f32 %v2265_v38, %v836_v54 }
 0xb0d   :  { %846 = vrot.lane.b32.xlu1 %v844_v55, %s2424_s20 }
 0xb70   :  { %v989_v56 = vpop.permute.xlu1 %988 }
 0xb71   :  { %2067 = vmatmul.mubr.msk.bf16.vlgmr.msra.gmra.mrb[28].mxu0 %vm113_vm1, %v989_v56 }
 0xb72   :  { %2155 = vmatpush3.bf16.msra.mxu0 %v2561_v6  ;;  %2158 = vmatprep.mubr.msk.bf16.mxu0 %vm2433_vm0, %v2432_v2 }
 0xb73   :  { %2156 = vmatprep.subr.bf16.mxu0 %v2432_v2 }
 0xb76   :  { %2157 = vmatpush3.bf16.msra.mxu0 %v2564_v10 }
 0xb77   :  { %1213 = vmatprep.subr.bf16.mxu0 %v2583_v32 }
 0xb79   :  { %2159 = vmatmul.mubr.msk.bf16.vlgmr.msra.gmra.mrb[32].mxu0 %vm113_vm1, %v989_v56 }
 0xb7a   :  { %1214 = vmatpush1.bf16.msra.mxu0 %v2585_v33  ;;  %1245 = vmatprep.mubr.bf16.mxu0 %v2434_v12 }
 0xb7b   :  { %1215 = vmatprep.subr.bf16.mxu0 %v2587_v34 }
 0xb7e   :  { %1216 = vmatpush1.bf16.msra.mxu0 %v2591_v35 }
 0xb7f   :  { %v847_v58 = vpop.permute.xlu1 %846  ;;  %2162 = vmatprep.subr.bf16.mxu0 %v2432_v2 }
 0xb80   :  { %v2768_v59 = vadd.f32 %v847_v58, %v843_v57 }
 0xb82   :  { %2266 = vtanh.f32 %v2768_v59 }
 0xb8c   :  { %v2267_v60 = vpop.eup %2266 }
 0xb8d   :  { %855 = vrot.lane.b32.xlu0 %v2267_v60, %s2424_s20 }
 0xbff   :  { %v856_v49 = vpop.permute.xlu0 %855 }
 0xc00   :  { %v858_v4 = vmul.f32 %v856_v49, %v852_v62 }
 0xc02   :  { %v859_v5 = vpack.c.bf16 %v858_v4, %v858_v4  ;;  %v1969_v7 = vrot.slane %v858_v4, %v2773_v61 }
 0xc04   :  { %v2779_v11 = vsel %vm2003_vm4, %v2002_v9, %v1969_v7  ;;  %2065 = vmatmul.mubr.msk.bf16.vlgmr.msra.gmra.mrb[12].mxu1 %vm419_vm2, %v859_v5 }
 0xc05   :  { %1084 = vmatpush1.bf16.msra.mxu1 %v2636_v25  ;;  %1115 = vmatprep.mubr.bf16.mxu1 %v2434_v12 }
 0xc06   :  { %1085 = vmatprep.subr.bf16.mxu1 %v2638_v26 }
 0xc09   :  { %1086 = vmatpush1.bf16.msra.mxu1 %v2642_v27 }
 0xc0a   :  { %1087 = vmatprep.subr.bf16.mxu1 %v2645_v28 }
 0xc0d   :  { %1088 = vmatpush1.bf16.msra.mxu1 %v2648_v29 }
 0xc0e   :  { %1089 = vmatprep.subr.bf16.mxu1 %v2664_v37 }
 0xc11   :  { %1090 = vmatpush1.bf16.msra.mxu1 %v2669_v39 }
 0xc12   :  { %1303 = vmatprep.subr.bf16.mxu1 %v2634_v24 }
 0xc44   :  { %v1027_v63 = vpop.f32.mrb[28].mxu0 }
 0xc45   :  { %v1029_v43 = vpop.f32.mrb[29].mxu0 }
 0xc46   :  { %v1036_v53 = vcombine.low %v1027_v63, %v1029_v43  ;;  %v1031_v13 = vpop.f32.mrb[30].mxu0 }
 0xc47   :  { %v1032_v14 = vpop.f32.mrb[31].mxu0 }
 0xc48   :  { %v1043_v48 = vrot.slane %v1036_v53, %v2620_v3 }
 0xc4a   :  { %v1050_v52 = vrot.slane %v1043_v48, %v2620_v3 }
 0xc4c   :  { %v1177_v15 = vpop.f32.mrb[32].mxu0 }
 0xc4d   :  { %v1183_v17 = vadd.f32 %v1177_v15, %v2578_v16  ;;  %v2160_v18 = vpop.f32.mrb[33].mxu0 }
 0xc4e   :  { %v1180_v19 = vpop.f32.mrb[34].mxu0 }
 0xc4f   :  { %2268 = vtanh.f32 %v1183_v17  ;;  %v2161_v21 = vpop.f32.mrb[35].mxu0  ;;  %v1184_v23 = vmul.f32 0.5, %v1183_v17 }
 0xc51   :  { %2270 = vtanh.f32 %v1184_v23 }
 0xc59   :  { %v2269_v22 = vpop.eup %2268 }
 0xc5a   :  { %1191 = vrot.lane.b32.xlu1 %v2269_v22, %s2435_s0 }
 0xc5b   :  { %v2271_v30 = vpop.eup %2270 }
 0xc5c   :  { %v1186_v31 = vmul.f32 0.5, %v2271_v30 }
 0xc5e   :  { %v1187_v36 = vadd.f32 0.5, %v1186_v31 }
 0xc60   :  { %v1189_v38 = vmul.f32 %v1187_v36, %v2747_v42 }
 0xccc   :  { %v1192_v40 = vpop.permute.xlu1 %1191 }
 0xccd   :  { %v1194_v1 = vmul.f32 %v1192_v40, %v1187_v36 }
 0xccf   :  { %1196 = vrot.lane.b32.xlu0 %v1194_v1, %s2435_s0 }
 0xcd7   :  { %v897_v41 = vpop.f32.mrb[12].mxu1 }
 0xcd8   :  { %v899_v44 = vpop.f32.mrb[13].mxu1 }
 0xcd9   :  { %v906_v45 = vcombine.low %v897_v41, %v899_v44  ;;  %v901_v46 = vpop.f32.mrb[14].mxu1 }
 0xcda   :  { %v902_v47 = vpop.f32.mrb[15].mxu1 }
 0xcdb   :  { %v913_v50 = vrot.slane %v906_v45, %v2620_v3 }
 0xcdd   :  { %v920_v51 = vrot.slane %v913_v50, %v2620_v3 }
 0xcdf   :  { %v922_v20 = vadd.f32 %v920_v51, %v2627_v8 }
 0xce1   :  { %v1052_v54 = vadd.f32 %v1050_v52, %v922_v20 }
 0xce3   :  { %v1053_v58 = vmul.f32 0.5, %v1052_v54 }
 0xd41   :  { %v1197_v55 = vpop.permute.xlu0 %1196 }
 0xd42   :  { %v2800_v56 = vadd.f32 %v1197_v55, %v1189_v38 }
 0xd44   :  { %2272 = vtanh.f32 %v2800_v56 }
 0xd45   :  { %2274 = vtanh.f32 %v1053_v58 }
 0xd4e   :  { %v2273_v57 = vpop.eup %2272 }
 0xd4f   :  { %1202 = vrot.lane.b32.xlu1 %v2273_v57, %s2435_s0  ;;  %v2275_v42 = vpop.eup %2274 }
 0xd50   :  { %v1055_v5 = vmul.f32 0.5, %v2275_v42 }
 0xd52   :  { %v1056_v7 = vadd.f32 0.5, %v1055_v5 }
 0xd53   :  { %1058 = vrot.lane.b32.xlu1 %v1052_v54, %s2424_s20 }
 0xd54   :  { %v1063_v53 = vmul.f32 %v1056_v7, %v2768_v59  ;;  %v1072_v14 = vrot.slane %v1056_v7, 1 }
 0xdc1   :  { %v1203_v60 = vpop.permute.xlu1 %1202 }
 0xdc2   :  { %v1205_v62 = vmul.f32 %v1203_v60, %v1187_v36 }
 0xdc4   :  { %v1206_v0 = vpack.c.bf16 %v1205_v62, %v1205_v62 }
 0xdc5   :  { %v1059_v49 = vpop.permute.xlu1 %1058 }
 0xdc6   :  { %v1060_v4 = vrot.slane %v1059_v49, 1  ;;  %1208 = vrot.lane.b32.xlu0 %v1206_v0, %s2424_s20 }
 0xdc8   :  { %2276 = vtanh.f32 %v1060_v4 }
 0xdd2   :  { %v2277_v9 = vpop.eup %2276 }
 0xdd3   :  { %v1064_v63 = vmul.f32 %v2277_v9, %v1056_v7 }
 0xdd5   :  { %1066 = vrot.lane.b32.xlu0 %v1064_v63, %s2424_s20 }
 0xe38   :  { %v1209_v43 = vpop.permute.xlu0 %1208 }
 0xe39   :  { %2070 = vmatmul.mubr.msk.bf16.vlgmr.msra.gmra.mrb[36].mxu0 %vm113_vm1, %v1209_v43 }
 0xe3a   :  { %2163 = vmatpush3.bf16.msra.mxu0 %v2561_v6  ;;  %2166 = vmatprep.mubr.msk.bf16.mxu0 %vm2433_vm0, %v2432_v2 }
 0xe3b   :  { %2164 = vmatprep.subr.bf16.mxu0 %v2432_v2 }
 0xe3e   :  { %2165 = vmatpush3.bf16.msra.mxu0 %v2564_v10 }
 0xe3f   :  { %1433 = vmatprep.subr.bf16.mxu0 %v2583_v32 }
 0xe41   :  { %2167 = vmatmul.mubr.msk.bf16.vlgmr.msra.gmra.mrb[40].mxu0 %vm113_vm1, %v1209_v43 }
 0xe42   :  { %1434 = vmatpush1.bf16.msra.mxu0 %v2585_v33  ;;  %1465 = vmatprep.mubr.bf16.mxu0 %v2434_v12 }
 0xe43   :  { %1435 = vmatprep.subr.bf16.mxu0 %v2587_v34 }
 0xe46   :  { %1436 = vmatpush1.bf16.msra.mxu0 %v2591_v35 }
 0xe47   :  { %v1067_v6 = vpop.permute.xlu0 %1066  ;;  %2170 = vmatprep.subr.bf16.mxu0 %v2432_v2 }
 0xe48   :  { %v2821_v13 = vadd.f32 %v1067_v6, %v1063_v53 }
 0xe4a   :  { %2278 = vtanh.f32 %v2821_v13 }
 0xe54   :  { %v2279_v10 = vpop.eup %2278 }
 0xe55   :  { %1075 = vrot.lane.b32.xlu1 %v2279_v10, %s2424_s20 }
 0xec7   :  { %v1076_v15 = vpop.permute.xlu1 %1075 }
 0xec8   :  { %v1078_v17 = vmul.f32 %v1076_v15, %v1072_v14 }
 0xeca   :  { %v1079_v18 = vpack.c.bf16 %v1078_v17, %v1078_v17  ;;  %v1975_v19 = vrot.slane %v1078_v17, %v2773_v61 }
 0xecc   :  { %v2827_v59 = vsel %vm2005_vm5, %v2779_v11, %v1975_v19  ;;  %2068 = vmatmul.mubr.msk.bf16.vlgmr.msra.gmra.mrb[16].mxu1 %vm419_vm2, %v1079_v18 }
 0xecd   :  { %1304 = vmatpush1.bf16.msra.mxu1 %v2636_v25  ;;  %1335 = vmatprep.mubr.bf16.mxu1 %v2434_v12 }
 0xece   :  { %1305 = vmatprep.subr.bf16.mxu1 %v2638_v26 }
 0xed1   :  { %1306 = vmatpush1.bf16.msra.mxu1 %v2642_v27 }
 0xed2   :  { %1307 = vmatprep.subr.bf16.mxu1 %v2645_v28 }
 0xed5   :  { %1308 = vmatpush1.bf16.msra.mxu1 %v2648_v29 }
 0xed6   :  { %1309 = vmatprep.subr.bf16.mxu1 %v2664_v37 }
 0xed9   :  { %1310 = vmatpush1.bf16.msra.mxu1 %v2669_v39 }
 0xeda   :  { %1523 = vmatprep.subr.bf16.mxu1 %v2634_v24 }
 0xf0c   :  { %v1247_v11 = vpop.f32.mrb[36].mxu0 }
 0xf0d   :  { %v1249_v21 = vpop.f32.mrb[37].mxu0 }
 0xf0e   :  { %v1256_v22 = vcombine.low %v1247_v11, %v1249_v21  ;;  %v1251_v23 = vpop.f32.mrb[38].mxu0 }
 0xf0f   :  { %v1252_v30 = vpop.f32.mrb[39].mxu0 }
 0xf10   :  { %v1263_v57 = vrot.slane %v1256_v22, %v2620_v3  ;;  %v2861_v30 = vld [vmem:[#allocation5] sm:$0xff]  }
 0xf12   :  { %v1270_v0 = vrot.slane %v1263_v57, %v2620_v3 }
 0xf14   :  { %v1397_v31 = vpop.f32.mrb[40].mxu0 }
 0xf15   :  { %v1403_v36 = vadd.f32 %v1397_v31, %v2578_v16  ;;  %v2168_v40 = vpop.f32.mrb[41].mxu0 }
 0xf16   :  { %v1400_v1 = vpop.f32.mrb[42].mxu0 }
 0xf17   :  { %2280 = vtanh.f32 %v1403_v36  ;;  %v2169_v41 = vpop.f32.mrb[43].mxu0  ;;  %v1404_v45 = vmul.f32 0.5, %v1403_v36 }
 0xf19   :  { %2282 = vtanh.f32 %v1404_v45 }
 0xf21   :  { %v2281_v44 = vpop.eup %2280 }
 0xf22   :  { %1411 = vrot.lane.b32.xlu0 %v2281_v44, %s2435_s0 }
 0xf23   :  { %v2283_v46 = vpop.eup %2282 }
 0xf24   :  { %v1406_v47 = vmul.f32 0.5, %v2283_v46 }
 0xf26   :  { %v1407_v48 = vadd.f32 0.5, %v1406_v47 }
 0xf28   :  { %v1409_v4 = vmul.f32 %v1407_v48, %v2800_v56 }
 0xf94   :  { %v1412_v50 = vpop.permute.xlu0 %1411 }
 0xf95   :  { %v1414_v51 = vmul.f32 %v1412_v50, %v1407_v48 }
 0xf97   :  { %1416 = vrot.lane.b32.xlu1 %v1414_v51, %s2435_s0 }
 0xf9f   :  { %v1117_v20 = vpop.f32.mrb[16].mxu1 }
 0xfa0   :  { %v1119_v52 = vpop.f32.mrb[17].mxu1 }
 0xfa1   :  { %v1126_v54 = vcombine.low %v1117_v20, %v1119_v52  ;;  %v1121_v38 = vpop.f32.mrb[18].mxu1 }
 0xfa2   :  { %v1122_v55 = vpop.f32.mrb[19].mxu1 }
 0xfa3   :  { %v1133_v58 = vrot.slane %v1126_v54, %v2620_v3 }
 0xfa5   :  { %v1140_v60 = vrot.slane %v1133_v58, %v2620_v3 }
 0xfa7   :  { %v1142_v62 = vadd.f32 %v1140_v60, %v2627_v8 }
 0xfa9   :  { %v1272_v49 = vadd.f32 %v1270_v0, %v1142_v62 }
 0xfab   :  { %1278 = vrot.lane.b32.xlu1 %v1272_v49, %s2424_s20  ;;  %v1273_v7 = vmul.f32 0.5, %v1272_v49 }
0x1009   :  { %v1417_v42 = vpop.permute.xlu1 %1416 }
0x100a   :  { %v2849_v5 = vadd.f32 %v1417_v42, %v1409_v4 }
0x100c   :  { %2284 = vtanh.f32 %v2849_v5 }
0x100d   :  { %2286 = vtanh.f32 %v1273_v7 }
0x1016   :  { %v2285_v9 = vpop.eup %2284 }
0x1017   :  { %1422 = vrot.lane.b32.xlu0 %v2285_v9, %s2435_s0  ;;  %v2287_v53 = vpop.eup %2286 }
0x1018   :  { %v1275_v6 = vmul.f32 0.5, %v2287_v53 }
0x101a   :  { %v1276_v10 = vadd.f32 0.5, %v1275_v6 }
0x101c   :  { %v1283_v19 = vmul.f32 %v1276_v10, %v2821_v13  ;;  %v2867_v13 = vld [vmem:[#allocation5 + $0x8] sm:$0xff]   ;;  %v1292_v31 = vrot.slane %v1276_v10, 1 }
0x101d   :  { %v1279_v63 = vpop.permute.xlu1 %1278 }
0x101e   :  { %v1280_v43 = vrot.slane %v1279_v63, 1 }
0x1020   :  { %2288 = vtanh.f32 %v1280_v43 }
0x102a   :  { %v2289_v14 = vpop.eup %2288 }
0x102b   :  { %v1284_v15 = vmul.f32 %v2289_v14, %v1276_v10 }
0x102d   :  { %1286 = vrot.lane.b32.xlu1 %v1284_v15, %s2424_s20 }
0x1089   :  { %v1423_v56 = vpop.permute.xlu0 %1422 }
0x108a   :  { %v1425_v17 = vmul.f32 %v1423_v56, %v1407_v48 }
0x108c   :  { %v1426_v18 = vpack.c.bf16 %v1425_v17, %v1425_v17 }
0x108e   :  { %1428 = vrot.lane.b32.xlu0 %v1426_v18, %s2424_s20 }
0x109f   :  { %v1287_v11 = vpop.permute.xlu1 %1286 }
0x10a0   :  { %v2856_v21 = vadd.f32 %v1287_v11, %v1283_v19 }
0x10a2   :  { %2290 = vtanh.f32 %v2856_v21 }
0x10ac   :  { %v2291_v22 = vpop.eup %2290 }
0x10ad   :  { %1295 = vrot.lane.b32.xlu0 %v2291_v22, %s2424_s20 }
0x1100   :  { %v1429_v23 = vpop.permute.xlu0 %1428 }
0x1101   :  { %2073 = vmatmul.mubr.msk.bf16.vlgmr.msra.gmra.mrb[44].mxu0 %vm113_vm1, %v1429_v23 }
0x1102   :  { %2171 = vmatpush3.bf16.msra.mxu0 %v2861_v30  ;;  %2174 = vmatprep.mubr.msk.bf16.mxu0 %vm2433_vm0, %v2432_v2 }
0x1103   :  { %2172 = vmatprep.subr.bf16.mxu0 %v2432_v2 }
0x1106   :  { %2173 = vmatpush3.bf16.msra.mxu0 %v2867_v13 }
0x1107   :  { %1653 = vmatprep.subr.bf16.mxu0 %v2583_v32 }
0x1109   :  { %2175 = vmatmul.mubr.msk.bf16.vlgmr.msra.gmra.mrb[48].mxu0 %vm113_vm1, %v1429_v23 }
0x110a   :  { %1654 = vmatpush1.bf16.msra.mxu0 %v2585_v33  ;;  %1685 = vmatprep.mubr.bf16.mxu0 %v2434_v12 }
0x110b   :  { %1655 = vmatprep.subr.bf16.mxu0 %v2587_v34 }
0x110e   :  { %1656 = vmatpush1.bf16.msra.mxu0 %v2591_v35 }
0x110f   :  { %2178 = vmatprep.subr.bf16.mxu0 %v2432_v2 }
0x111f   :  { %v1296_v36 = vpop.permute.xlu0 %1295 }
0x1120   :  { %v1298_v40 = vmul.f32 %v1296_v36, %v1292_v31 }
0x1122   :  { %v1299_v1 = vpack.c.bf16 %v1298_v40, %v1298_v40  ;;  %v1981_v41 = vrot.slane %v1298_v40, %v2773_v61 }
0x1124   :  { %v2879_v32 = vsel %vm2007_vm6, %v2827_v59, %v1981_v41  ;;  %2071 = vmatmul.mubr.msk.bf16.vlgmr.msra.gmra.mrb[20].mxu1 %vm419_vm2, %v1299_v1 }
0x1125   :  { %1524 = vmatpush1.bf16.msra.mxu1 %v2636_v25  ;;  %1555 = vmatprep.mubr.bf16.mxu1 %v2434_v12 }
0x1126   :  { %1525 = vmatprep.subr.bf16.mxu1 %v2638_v26 }
0x1129   :  { %1526 = vmatpush1.bf16.msra.mxu1 %v2642_v27 }
0x112a   :  { %1527 = vmatprep.subr.bf16.mxu1 %v2645_v28 }
0x112d   :  { %1528 = vmatpush1.bf16.msra.mxu1 %v2648_v29 }
0x112e   :  { %1529 = vmatprep.subr.bf16.mxu1 %v2664_v37 }
0x1131   :  { %1530 = vmatpush1.bf16.msra.mxu1 %v2669_v39 }
0x1132   :  { %1743 = vmatprep.subr.bf16.mxu1 %v2634_v24 }
0x11d4   :  { %v1467_v33 = vpop.f32.mrb[44].mxu0 }
0x11d5   :  { %v1469_v34 = vpop.f32.mrb[45].mxu0 }
0x11d6   :  { %v1476_v35 = vcombine.low %v1467_v33, %v1469_v34  ;;  %v1471_v59 = vpop.f32.mrb[46].mxu0 }
0x11d7   :  { %v1472_v44 = vpop.f32.mrb[47].mxu0 }
0x11d8   :  { %v1483_v55 = vrot.slane %v1476_v35, %v2620_v3 }
0x11da   :  { %v1490_v62 = vrot.slane %v1483_v55, %v2620_v3 }
0x11dc   :  { %v1617_v45 = vpop.f32.mrb[48].mxu0 }
0x11dd   :  { %v1623_v46 = vadd.f32 %v1617_v45, %v2578_v16  ;;  %v2176_v47 = vpop.f32.mrb[49].mxu0 }
0x11de   :  { %v1620_v48 = vpop.f32.mrb[50].mxu0 }
0x11df   :  { %2292 = vtanh.f32 %v1623_v46  ;;  %v2177_v50 = vpop.f32.mrb[51].mxu0  ;;  %v1624_v49 = vmul.f32 0.5, %v1623_v46 }
0x11e1   :  { %2294 = vtanh.f32 %v1624_v49 }
0x11e9   :  { %v2293_v51 = vpop.eup %2292 }
0x11ea   :  { %1631 = vrot.lane.b32.xlu1 %v2293_v51, %s2435_s0  ;;  %v2939_v51 = vld [vmem:[%s2979_s6] sm:$0x3] }
0x11eb   :  { %v2295_v4 = vpop.eup %2294 }
0x11ec   :  { %v1626_v42 = vmul.f32 0.5, %v2295_v4 }
0x11ee   :  { %v1627_v7 = vadd.f32 0.5, %v1626_v42 }
0x11f0   :  { %v1629_v17 = vmul.f32 %v1627_v7, %v2849_v5 }
0x11f7   :  { %v1337_v20 = vpop.f32.mrb[20].mxu1 }
0x11f8   :  { %v1339_v52 = vpop.f32.mrb[21].mxu1 }
0x11f9   :  { %v1346_v54 = vcombine.low %v1337_v20, %v1339_v52  ;;  %v1341_v38 = vpop.f32.mrb[22].mxu1 }
0x11fa   :  { %v1342_v24 = vpop.f32.mrb[23].mxu1 }
0x11fb   :  { %v1353_v57 = vrot.slane %v1346_v54, %v2620_v3 }
0x11fd   :  { %v1360_v58 = vrot.slane %v1353_v57, %v2620_v3 }
0x11ff   :  { %v1362_v60 = vadd.f32 %v1360_v58, %v2627_v8 }
0x1201   :  { %v1492_v0 = vadd.f32 %v1490_v62, %v1362_v60 }
0x1203   :  { %1498 = vrot.lane.b32.xlu1 %v1492_v0, %s2424_s20  ;;  %v1493_v43 = vmul.f32 0.5, %v1492_v0 }
0x1205   :  { %2296 = vtanh.f32 %v1493_v43 }
0x120f   :  { %v2297_v8 = vpop.eup %2296 }
0x1210   :  { %v1495_v10 = vmul.f32 0.5, %v2297_v8 }
0x1212   :  { %v1496_v14 = vadd.f32 0.5, %v1495_v10 }
0x1214   :  { %v1503_v22 = vmul.f32 %v1496_v14, %v2856_v21  ;;  %v1512_v41 = vrot.slane %v1496_v14, 1 }
0x125c   :  { %v1632_v9 = vpop.permute.xlu1 %1631 }
0x125d   :  { %v1634_v63 = vmul.f32 %v1632_v9, %v1627_v7 }
0x125f   :  { %1636 = vrot.lane.b32.xlu0 %v1634_v63, %s2435_s0 }
0x1275   :  { %v1499_v53 = vpop.permute.xlu1 %1498 }
0x1276   :  { %v1500_v6 = vrot.slane %v1499_v53, 1 }
0x1278   :  { %2298 = vtanh.f32 %v1500_v6 }
0x1282   :  { %v2299_v15 = vpop.eup %2298 }
0x1283   :  { %v1504_v56 = vmul.f32 %v2299_v15, %v1496_v14 }
0x1285   :  { %1506 = vrot.lane.b32.xlu1 %v1504_v56, %s2424_s20 }
0x12d1   :  { %v1637_v18 = vpop.permute.xlu0 %1636 }
0x12d2   :  { %v2902_v19 = vadd.f32 %v1637_v18, %v1629_v17 }
0x12d4   :  { %2300 = vtanh.f32 %v2902_v19 }
0x12de   :  { %v2301_v11 = vpop.eup %2300 }
0x12df   :  { %1642 = vrot.lane.b32.xlu0 %v2301_v11, %s2435_s0 }
0x12f7   :  { %v1507_v23 = vpop.permute.xlu1 %1506 }
0x12f8   :  { %v2907_v31 = vadd.f32 %v1507_v23, %v1503_v22 }
0x12fa   :  { %2302 = vtanh.f32 %v2907_v31 }
0x1304   :  { %v2303_v36 = vpop.eup %2302 }
0x1305   :  { %1515 = vrot.lane.b32.xlu1 %v2303_v36, %s2424_s20 }
0x1351   :  { %v1643_v40 = vpop.permute.xlu0 %1642 }
0x1352   :  { %v1645_v5 = vmul.f32 %v1643_v40, %v1627_v7 }
0x1354   :  { %v1646_v1 = vpack.c.bf16 %v1645_v5, %v1645_v5 }
0x1356   :  { %1648 = vrot.lane.b32.xlu0 %v1646_v1, %s2424_s20 }
0x1377   :  { %v1516_v33 = vpop.permute.xlu1 %1515 }
0x1378   :  { %v1518_v34 = vmul.f32 %v1516_v33, %v1512_v41 }
0x137a   :  { %v1519_v35 = vpack.c.bf16 %v1518_v34, %v1518_v34  ;;  %v1987_v21 = vrot.slane %v1518_v34, %v2773_v61 }
0x137c   :  { %v2914_v59 = vsel %vm2009_vm7, %v2879_v32, %v1987_v21  ;;  %2074 = vmatmul.mubr.msk.bf16.vlgmr.msra.gmra.mrb[24].mxu1 %vm419_vm2, %v1519_v35 }
0x137d   :  { %1744 = vmatpush1.bf16.msra.mxu1 %v2636_v25  ;;  %1775 = vmatprep.mubr.bf16.mxu1 %v2434_v12  ;;  %v2324_v25 = vld [vmem:[#allocation7 + $0x4] ss:$8 sps:$4 sm:$0xff]  }
0x137e   :  { %1745 = vmatprep.subr.bf16.mxu1 %v2638_v26  ;;  %v2325_v26 = vld [vmem:[#allocation7] ss:$8 sps:$4 sm:$0xff]  }
0x1381   :  { %1746 = vmatpush1.bf16.msra.mxu1 %v2642_v27  ;;  %v2326_v27 = vld [vmem:[#allocation7 + $0x14] ss:$8 sps:$4 sm:$0xff]  }
0x1382   :  { %1747 = vmatprep.subr.bf16.mxu1 %v2645_v28  ;;  %v2327_v28 = vld [vmem:[#allocation7 + $0x10] ss:$8 sps:$4 sm:$0xff]  }
0x1385   :  { %1748 = vmatpush1.bf16.msra.mxu1 %v2648_v29 }
0x1386   :  { %1749 = vmatprep.subr.bf16.mxu1 %v2664_v37 }
0x1389   :  { %1750 = vmatpush1.bf16.msra.mxu1 %v2669_v39 }
0x13c8   :  { %v1649_v32 = vpop.permute.xlu0 %1648 }
0x13c9   :  { %2076 = vmatmul.mubr.msk.bf16.vlgmr.msra.gmra.mrb[52].mxu0 %vm113_vm1, %v1649_v32 }
0x13ca   :  { %2179 = vmatpush3.bf16.msra.mxu0 %v2861_v30  ;;  %2182 = vmatprep.mubr.msk.bf16.mxu0 %vm2433_vm0, %v2432_v2 }
0x13cb   :  { %2180 = vmatprep.subr.bf16.mxu0 %v2432_v2 }
0x13ce   :  { %2181 = vmatpush3.bf16.msra.mxu0 %v2867_v13 }
0x13cf   :  { %1873 = vmatprep.subr.bf16.mxu0 %v2324_v25 }
0x13d1   :  { %2183 = vmatmul.mubr.msk.bf16.vlgmr.msra.gmra.mrb[56].mxu0 %vm113_vm1, %v1649_v32 }
0x13d2   :  { %1874 = vmatpush1.bf16.msra.mxu0 %v2325_v26  ;;  %1905 = vmatprep.mubr.bf16.mxu0 %v2434_v12 }
0x13d3   :  { %1875 = vmatprep.subr.bf16.mxu0 %v2326_v27 }
0x13d6   :  { %1876 = vmatpush1.bf16.msra.mxu0 %v2327_v28 }
0x144f   :  { %v1557_v29 = vpop.f32.mrb[24].mxu1 }
0x1450   :  { %v1559_v37 = vpop.f32.mrb[25].mxu1 }
0x1451   :  { %v1566_v39 = vcombine.low %v1557_v29, %v1559_v37  ;;  %v1561_v30 = vpop.f32.mrb[26].mxu1 }
0x1452   :  { %v1562_v44 = vpop.f32.mrb[27].mxu1 }
0x1453   :  { %v1573_v2 = vrot.slane %v1566_v39, %v2620_v3 }
0x1455   :  { %v1580_v46 = vrot.slane %v1573_v2, %v2620_v3 }
0x1457   :  { %v1582_v20 = vadd.f32 %v2939_v51, %v1580_v46 }
0x149c   :  { %v1687_v13 = vpop.f32.mrb[52].mxu0 }
0x149d   :  { %v1689_v45 = vpop.f32.mrb[53].mxu0 }
0x149e   :  { %v1696_v47 = vcombine.low %v1687_v13, %v1689_v45  ;;  %v1691_v48 = vpop.f32.mrb[54].mxu0 }
0x149f   :  { %v1692_v50 = vpop.f32.mrb[55].mxu0 }
0x14a0   :  { %v1703_v12 = vrot.slane %v1696_v47, %v2620_v3 }
0x14a2   :  { %v1710_v52 = vrot.slane %v1703_v12, %v2620_v3 }
0x14a4   :  { %v1837_v54 = vpop.f32.mrb[56].mxu0  ;;  %v1712_v38 = vadd.f32 %v1710_v52, %v1582_v20 }
0x14a5   :  { %v1843_v24 = vadd.f32 %v1837_v54, %v2578_v16  ;;  %v2184_v55 = vpop.f32.mrb[57].mxu0 }
0x14a6   :  { %1718 = vrot.lane.b32.xlu1 %v1712_v38, %s2424_s20  ;;  %v1840_v57 = vpop.f32.mrb[58].mxu0  ;;  %v1713_v0 = vmul.f32 0.5, %v1712_v38 }
0x14a7   :  { %2304 = vtanh.f32 %v1843_v24  ;;  %v2185_v58 = vpop.f32.mrb[59].mxu0  ;;  %v1844_v62 = vmul.f32 0.5, %v1843_v24 }
0x14a9   :  { %2306 = vtanh.f32 %v1844_v62 }
0x14aa   :  { %2308 = vtanh.f32 %v1713_v0  ;;  %v2080_v0 = vld [vmem:[%s2980_s7] ss:$0 sm:$0xff] }
0x14b1   :  { %v2305_v60 = vpop.eup %2304 }
0x14b2   :  { %1851 = vrot.lane.b32.xlu0 %v2305_v60, %s2435_s0 }
0x14b3   :  { %v2307_v42 = vpop.eup %2306 }
0x14b4   :  { %v2309_v7 = vpop.eup %2308  ;;  %v1846_v9 = vmul.f32 0.5, %v2307_v42 }
0x14b5   :  { %v1715_v16 = vmul.f32 0.5, %v2309_v7  ;;  %v2081_v7 = vld [vmem:[#allocation2] ss:$0 sm:$0xff] }
0x14b6   :  { %v1847_v63 = vadd.f32 0.5, %v1846_v9 }
0x14b7   :  { %v1716_v53 = vadd.f32 0.5, %v1715_v16 }
0x14b8   :  { %v1849_v14 = vmul.f32 %v1847_v63, %v2902_v19 }
0x14b9   :  { %v1723_v56 = vmul.f32 %v1716_v53, %v2907_v31  ;;  %v1732_v40 = vrot.slane %v1716_v53, 1 }
0x1518   :  { %v1719_v49 = vpop.permute.xlu1 %1718 }
0x1519   :  { %v1720_v4 = vrot.slane %v1719_v49, 1 }
0x151b   :  { %2310 = vtanh.f32 %v1720_v4 }
0x1524   :  { %v1852_v43 = vpop.permute.xlu0 %1851 }
0x1525   :  { %v2311_v6 = vpop.eup %2310  ;;  %v1854_v8 = vmul.f32 %v1852_v43, %v1847_v63 }
0x1526   :  { %v1724_v10 = vmul.f32 %v2311_v6, %v1716_v53 }
0x1527   :  { %1856 = vrot.lane.b32.xlu0 %v1854_v8, %s2435_s0 }
0x1528   :  { %1726 = vrot.lane.b32.xlu1 %v1724_v10, %s2424_s20 }
0x1599   :  { %v1857_v15 = vpop.permute.xlu0 %1856 }
0x159a   :  { %v1859_v17 = vadd.f32 %v1857_v15, %v1849_v14  ;;  %v1727_v18 = vpop.permute.xlu1 %1726 }
0x159b   :  { %v1729_v11 = vadd.f32 %v1727_v18, %v1723_v56 }
0x159c   :  { %2312 = vtanh.f32 %v1859_v17 }
0x159d   :  { %2314 = vtanh.f32 %v1729_v11 }
0x15a6   :  { %v2313_v22 = vpop.eup %2312 }
0x15a7   :  { %v2315_v23 = vpop.eup %2314  ;;  %1862 = vrot.lane.b32.xlu0 %v2313_v22, %s2435_s0 }
0x15a8   :  { %1735 = vrot.lane.b32.xlu1 %v2315_v23, %s2424_s20 }
0x1619   :  { %v1863_v36 = vpop.permute.xlu0 %1862 }
0x161a   :  { %v1865_v5 = vmul.f32 %v1863_v36, %v1847_v63  ;;  %v1736_v1 = vpop.permute.xlu1 %1735 }
0x161b   :  { %v1738_v41 = vmul.f32 %v1736_v1, %v1732_v40 }
0x161c   :  { %v1866_v19 = vpack.c.bf16 %v1865_v5, %v1865_v5 }
0x161d   :  { %v1739_v33 = vpack.c.bf16 %v1738_v41, %v1738_v41  ;;  %v1993_v31 = vrot.slane %v1738_v41, %v2773_v61 }
0x161e   :  { %1868 = vrot.lane.b32.xlu0 %v1866_v19, %s2424_s20 }
0x161f   :  { %2077 = vmatmul.mubr.msk.bf16.vlgmr.msra.gmra.mrb[28].mxu1 %vm419_vm2, %v1739_v33  ;;  %v2012_v34 = vsel %vm2011_vm8, %v2914_v59, %v1993_v31 }
0x1690   :  { %v1869_v35 = vpop.permute.xlu0 %1868 }
0x1691   :  { %2079 = vmatmul.mubr.msk.bf16.vlgmr.msra.gmra.mrb[60].mxu0 %vm113_vm1, %v1869_v35 }
0x16f2   :  { %v1777_v21 = vpop.f32.mrb[28].mxu1 }
0x16f3   :  { %v1779_v32 = vpop.f32.mrb[29].mxu1 }
0x16f4   :  { %v1786_v25 = vcombine.low %v1777_v21, %v1779_v32  ;;  %v1781_v26 = vpop.f32.mrb[30].mxu1 }
0x16f5   :  { %v1782_v27 = vpop.f32.mrb[31].mxu1 }
0x16f6   :  { %v1793_v28 = vrot.slane %v1786_v25, %v2620_v3 }
0x16f8   :  { %v1800_v39 = vrot.slane %v1793_v28, %v2620_v3 }
0x16fa   :  { %v1802_v59 = vadd.f32 %v2939_v51, %v1800_v39 }
0x1764   :  { %v1907_v29 = vpop.f32.mrb[60].mxu0 }
0x1765   :  { %v1909_v37 = vpop.f32.mrb[61].mxu0 }
0x1766   :  { %v1916_v30 = vcombine.low %v1907_v29, %v1909_v37  ;;  %v1911_v44 = vpop.f32.mrb[62].mxu0 }
0x1767   :  { %v1912_v2 = vpop.f32.mrb[63].mxu0 }
0x1768   :  { %v1923_v13 = vrot.slane %v1916_v30, %v2620_v3 }
0x176a   :  { %v1930_v45 = vrot.slane %v1923_v13, %v2620_v3 }
0x176c   :  { %v1932_v46 = vadd.f32 %v1930_v45, %v1802_v59 }
0x176e   :  { %1938 = vrot.lane.b32.xlu1 %v1932_v46, %s2424_s20  ;;  %v1933_v47 = vmul.f32 0.5, %v1932_v46 }
0x1770   :  { %2316 = vtanh.f32 %v1933_v47 }
0x177a   :  { %v2317_v12 = vpop.eup %2316 }
0x177b   :  { %v1935_v20 = vmul.f32 0.5, %v2317_v12 }
0x177d   :  { %v1936_v52 = vadd.f32 0.5, %v1935_v20 }
0x177f   :  { %v1943_v24 = vmul.f32 %v1936_v52, %v1729_v11  ;;  %v1952_v57 = vrot.slane %v1936_v52, 1 }
0x17e0   :  { %v1939_v48 = vpop.permute.xlu1 %1938 }
0x17e1   :  { %v1940_v50 = vrot.slane %v1939_v48, 1 }
0x17e3   :  { %2318 = vtanh.f32 %v1940_v50 }
0x17ed   :  { %v2319_v54 = vpop.eup %2318 }
0x17ee   :  { %v1944_v38 = vmul.f32 %v2319_v54, %v1936_v52 }
0x17f0   :  { %1946 = vrot.lane.b32.xlu0 %v1944_v38, %s2424_s20 }
0x1862   :  { %v1947_v55 = vpop.permute.xlu0 %1946 }
0x1863   :  { %v1949_v51 = vadd.f32 %v1947_v55, %v1943_v24 }
0x1865   :  { %2320 = vtanh.f32 %v1949_v51 }
0x186f   :  { %v2321_v3 = vpop.eup %2320 }
0x1870   :  { %1955 = vrot.lane.b32.xlu1 %v2321_v3, %s2424_s20 }
0x18e2   :  { %v1956_v58 = vpop.permute.xlu1 %1955 }
0x18e3   :  { %v1958_v60 = vmul.f32 %v1956_v58, %v1952_v57 }
0x18e5   :  { %v1999_v62 = vrot.slane %v1958_v60, %v2773_v61 }
0x18e7   :  { %v2014_v49 = vsel %vm2013_vm9, %v2012_v34, %v1999_v62 }
0x18e8   :  { %v2022_v4 = vmul.f32 %v2080_v0, %v2014_v49 }
0x18ea   :  { %v2023_v42 = vsel %vm419_vm2, %v2022_v4, 0.0 }
0x18eb   :  { %2024 = vadd.xlane.f32.xlu0 %v2023_v42 }
0x1978   :  { %v2025_v9 = vpop.xlane.xlu0 %2024 }
0x1979   :  { %v2033_v16 = vadd.f32 %v2081_v7, %v2025_v9 }
0x197b   :  { %2035 = vst.msk [vmem:[%s2982_s9] sm:$0xff] %vm2034_vm10, %v2033_v16 }
0x197c   :  { %2040 = vsyncpa [#allocation4], 1 }
0x197d   :  { %2041 = vsyncpa [#allocation6], 1 }
0x197e   :  { %2042 = vsyncpa [#allocation9], 1 }

</bundles_post_ra>
